<compile_context>
chip_gen: v7x
topology: tpu7x:2x2x1
jax: 0.10.0
libtpu: 0.0.40
codegen_flags: <defaults>
</compile_context>

<pallas_src>
import numpy as np
import jax
import jax.numpy as jnp
from jax.experimental import pallas as pl
from jax.experimental.pallas import tpu as pltpu

# ----------------------------- config ---------------------------------------
HIDDEN = 32          # config.hidden_size
NUM_HEADS = 4        # config.num_attention_heads
HEAD_DIM = HIDDEN // NUM_HEADS          # 8
NUM_KV_HEADS = 2     # config.multi_query_group_num
FFN = 64             # config.ffn_hidden_size
NUM_LAYERS = 2       # config.num_layers
EPS = 1e-5           # config.layernorm_epsilon
ROPE_BASE = 10000.0  # 10000 * rope_ratio(=1.0)
ROTARY_DIM = HEAD_DIM // 2              # 4
T = 8                # number of tokens

DQ = NUM_HEADS * HEAD_DIM               # 32
DK = NUM_KV_HEADS * HEAD_DIM            # 16
SCALE = HEAD_DIM ** -0.5
GROUP = NUM_HEADS // NUM_KV_HEADS       # query heads per kv head
VEC_W = 2 * HIDDEN + DQ + 2 * DK        # 128 (lane-dense packed per-layer vectors)

# The roll-based RoPE relies on B_even/B_odd being zero outside the rotary lanes
# and on pairs (2i, 2i+1) never straddling a head boundary.
assert HEAD_DIM % 2 == 0 and ROTARY_DIM % 2 == 0 and ROTARY_DIM <= HEAD_DIM


# ------------------------- shared block math --------------------------------
def _rmsnorm(x, w):
    var = jnp.mean(x * x, axis=-1, keepdims=True)
    return x * jax.lax.rsqrt(var + EPS) * w


def _roll_last(x, shift):
    """np.roll along the last axis, written as slice+concat (no MXU)."""
    n = x.shape[-1]
    s = shift % n
    if s == 0:
        return x
    return jnp.concatenate([x[:, n - s:], x[:, :n - s]], axis=-1)


def _block_math(x, ropeq, ropek, mask_g, ln1_w, bqkv, ln2_w, wqkv, wo, wgu, wdn,
                recip=lambda v: 1.0 / v):
    """One GLMBlock. Used both inside the Pallas kernel and as the pure-JAX reference."""
    n = x.shape[0]
    D = HEAD_DIM

    # --- input_layernorm (RMSNorm) ---
    ln1 = _rmsnorm(x, ln1_w)

    # --- QKVParallelLinear (single fused matmul, qkv bias) ---
    qkv = jnp.dot(ln1, wqkv, preferred_element_type=jnp.float32) + bqkv
    q = qkv[:, :DQ]
    k = qkv[:, DQ:DQ + DK]
    v = qkv[:, DQ + DK:]

    # --- partial interleaved RoPE via lane rolls.
    #     rotated = x*A + roll(x,-1)*B_even + roll(x,+1)*B_odd
    #     (attention SCALE is folded into the q multipliers, incl. pass-through A)
    aq, bqe, bqo = ropeq[:, :DQ], ropeq[:, DQ:2 * DQ], ropeq[:, 2 * DQ:]
    ak, bke, bko = ropek[:, :DK], ropek[:, DK:2 * DK], ropek[:, 2 * DK:]
    q = q * aq + _roll_last(q, DQ - 1) * bqe + _roll_last(q, 1) * bqo
    k = k * ak + _roll_last(k, DK - 1) * bke + _roll_last(k, 1) * bko

    # --- causal GQA attention, batched over KV heads only.
    #     q folded to [KV, GROUP*T, D] (group heads stacked into the M dim),
    #     k/v [KV, T, D]; 2 batched einsums instead of 4 replicated per-head ones.
    q_kv = jnp.stack(
        [jnp.concatenate([q[:, (kv * GROUP + g) * D:(kv * GROUP + g + 1) * D]
                          for g in range(GROUP)], axis=0)
         for kv in range(NUM_KV_HEADS)], axis=0)                      # [KV, G*T, D]
    k_kv = jnp.stack([k[:, kv * D:(kv + 1) * D]
                      for kv in range(NUM_KV_HEADS)], axis=0)         # [KV, T, D]
    v_kv = jnp.stack([v[:, kv * D:(kv + 1) * D]
                      for kv in range(NUM_KV_HEADS)], axis=0)         # [KV, T, D]

    s = jnp.einsum('kmd,ksd->kms', q_kv, k_kv,
                   preferred_element_type=jnp.float32)                # [KV, G*T, T]
    s = jnp.where(mask_g[None, :, :], s, -1e30)
    m = jnp.max(s, axis=-1, keepdims=True)
    p = jnp.exp(s - m)
    lsum = jnp.sum(p, axis=-1, keepdims=True)
    ctx_kv = jnp.einsum('kms,ksd->kmd', p, v_kv,
                        preferred_element_type=jnp.float32) * recip(lsum)
    # un-fold back to [T, DQ]; head h = kv*GROUP + g lives in ctx_kv[kv, g*T:(g+1)*T]
    ctx = jnp.concatenate(
        [ctx_kv[kv, g * n:(g + 1) * n, :]
         for kv in range(NUM_KV_HEADS) for g in range(GROUP)], axis=-1)   # [T, DQ]

    # --- dense (RowParallelLinear, no bias) + residual (post-ln residual = False) ---
    attn_out = jnp.dot(ctx, wo, preferred_element_type=jnp.float32)
    res1 = x + attn_out

    # --- post_attention_layernorm + MLP (SwiGLU) + residual ---
    ln2 = _rmsnorm(res1, ln2_w)
    gu = jnp.dot(ln2, wgu, preferred_element_type=jnp.float32)   # [T, 2*FFN]
    gate = gu[:, :FFN]
    up = gu[:, FFN:]
    act = gate * jax.nn.sigmoid(gate) * up                       # SiluAndMul
    mlp_out = jnp.dot(act, wdn, preferred_element_type=jnp.float32)
    return mlp_out + res1


# ----------------------------- fused kernel ----------------------------------
def glm_fused_kernel(x_ref, ropeq_ref, ropek_ref, fnorm_ref, vecs_ref,
                     wqkv_ref, wo_ref, wgu_ref, wdn_ref, out_ref):
    # Grid-less call: every ref is the whole (tiny) array, resident in VMEM.
    x = x_ref[...]
    ropeq = ropeq_ref[...]
    ropek = ropek_ref[...]

    # Layer-invariant causal mask, hoisted out of the layer loop.
    row = jax.lax.broadcasted_iota(jnp.int32, (T, T), 0)
    col = jax.lax.broadcasted_iota(jnp.int32, (T, T), 1)
    causal = row >= col
    mask_g = jnp.concatenate([causal] * GROUP, axis=0)           # [GROUP*T, T]

    def layer_body(l, h):
        vec = vecs_ref[l]                                        # [1, VEC_W]
        ln1_w = vec[:, :HIDDEN]
        ln2_w = vec[:, HIDDEN:2 * HIDDEN]
        bqkv = vec[:, 2 * HIDDEN:]
        return _block_math(
            h, ropeq, ropek, mask_g, ln1_w, bqkv, ln2_w,
            wqkv_ref[l], wo_ref[l], wgu_ref[l], wdn_ref[l],
            recip=lambda v: pl.reciprocal(v, approx=True))       # EUP, off the VALU

    h = jax.lax.fori_loop(0, NUM_LAYERS, layer_body, x, unroll=True)

    # post_layer_norm = True
    out_ref[...] = _rmsnorm(h, fnorm_ref[...])


# --------------------------- RoPE precompute ---------------------------------
def rope_pack(position_ids, num_heads, scale):
    """Packed [T, 3*num_heads*HEAD_DIM] = [A | B_even | B_odd] multipliers for the
    roll-based interleaved partial rotary; `scale` folds the attention scaling."""
    pos = position_ids.astype(jnp.float32)
    half = ROTARY_DIM // 2
    inv_freq = ROPE_BASE ** (-(jnp.arange(half, dtype=jnp.float32) * 2.0) / ROTARY_DIM)
    ang = pos[:, None] * inv_freq[None, :]                       # [T, half]
    cos = jnp.repeat(jnp.cos(ang), 2, axis=1)                    # [T, ROTARY_DIM]
    sin = jnp.repeat(jnp.sin(ang), 2, axis=1)
    n = pos.shape[0]
    parity = jnp.arange(ROTARY_DIM) % 2
    ones_tail = jnp.ones((n, HEAD_DIM - ROTARY_DIM), jnp.float32)
    zero_tail = jnp.zeros((n, HEAD_DIM - ROTARY_DIM), jnp.float32)
    a_head = jnp.concatenate([cos, ones_tail], axis=1)
    be_head = jnp.concatenate([jnp.where(parity[None, :] == 0, -sin, 0.0), zero_tail], 1)
    bo_head = jnp.concatenate([jnp.where(parity[None, :] == 1, sin, 0.0), zero_tail], 1)
    a = jnp.tile(a_head, (1, num_heads)) * scale
    be = jnp.tile(be_head, (1, num_heads)) * scale
    bo = jnp.tile(bo_head, (1, num_heads)) * scale
    return jnp.concatenate([a, be, bo], axis=1).astype(jnp.float32)


# ----------------------------- parameters ------------------------------------
def init_params(key):
    vecs, wqkvs, wos, wgus, wdns = [], [], [], [], []
    for _ in range(NUM_LAYERS):
        key, *ks = jax.random.split(key, 8)
        ln1_w = 1.0 + 0.01 * jax.random.normal(ks[0], (HIDDEN,))
        wqkv = 0.05 * jax.random.normal(ks[1], (HIDDEN, DQ + 2 * DK))
        bqkv = 0.05 * jax.random.normal(ks[2], (DQ + 2 * DK,))
        wo = 0.05 * jax.random.normal(ks[3], (DQ, HIDDEN))
        ln2_w = 1.0 + 0.01 * jax.random.normal(ks[4], (HIDDEN,))
        wgu = 0.05 * jax.random.normal(ks[5], (HIDDEN, 2 * FFN))
        wdn = 0.05 * jax.random.normal(ks[6], (FFN, HIDDEN))
        vecs.append(jnp.concatenate([ln1_w, ln2_w, bqkv])[None, :])   # [1, 128]
        wqkvs.append(wqkv); wos.append(wo); wgus.append(wgu); wdns.append(wdn)
    key, kf = jax.random.split(key)
    final_ln_w = (1.0 + 0.01 * jax.random.normal(kf, (1, HIDDEN))).astype(jnp.float32)
    return (jnp.stack(vecs).astype(jnp.float32),       # [L, 1, 128]
            jnp.stack(wqkvs).astype(jnp.float32),      # [L, HIDDEN, DQ+2*DK]
            jnp.stack(wos).astype(jnp.float32),        # [L, DQ, HIDDEN]
            jnp.stack(wgus).astype(jnp.float32),       # [L, HIDDEN, 2*FFN]
            jnp.stack(wdns).astype(jnp.float32),       # [L, FFN, HIDDEN]
            final_ln_w)                                # [1, HIDDEN]


# ------------------------------ transformer ----------------------------------
@jax.jit
def glm_transformer(hidden_states, position_ids, params):
    vecs, wqkv, wo, wgu, wdn, final_ln_w = params
    ropeq = rope_pack(position_ids, NUM_HEADS, SCALE)    # [T, 3*DQ]
    ropek = rope_pack(position_ids, NUM_KV_HEADS, 1.0)   # [T, 3*DK]

    # Grid-less call: all operands (< ~100 KB total) are copied to VMEM once and
    # stay resident for the whole forward pass.
    # TODO(synk): at real ChatGLM sizes (HIDDEN=4096, FFN=13696) this must regain
    #             a token-parallel + K/N-tiled grid with explicit vmem_limit_bytes.
    n_in = 9
    in_specs = [pl.BlockSpec(memory_space=pltpu.MemorySpace.VMEM) for _ in range(n_in)]
    out_spec = pl.BlockSpec(memory_space=pltpu.MemorySpace.VMEM)

    return pl.pallas_call(
        glm_fused_kernel,
        out_shape=jax.ShapeDtypeStruct((T, HIDDEN), jnp.float32),
        in_specs=in_specs,
        out_specs=out_spec,
    )(hidden_states, ropeq, ropek, final_ln_w, vecs, wqkv, wo, wgu, wdn)


def glm_transformer_ref(hidden_states, position_ids, params):
    vecs, wqkv, wo, wgu, wdn, final_ln_w = params
    ropeq = rope_pack(position_ids, NUM_HEADS, SCALE)
    ropek = rope_pack(position_ids, NUM_KV_HEADS, 1.0)
    row = jax.lax.broadcasted_iota(jnp.int32, (T, T), 0)
    col = jax.lax.broadcasted_iota(jnp.int32, (T, T), 1)
    mask_g = jnp.concatenate([row >= col] * GROUP, axis=0)
    x = hidden_states
    for l in range(NUM_LAYERS):
        vec = vecs[l]                                    # [1, VEC_W]
        ln1_w = vec[:, :HIDDEN]
        ln2_w = vec[:, HIDDEN:2 * HIDDEN]
        bqkv = vec[:, 2 * HIDDEN:]
        x = _block_math(x, ropeq, ropek, mask_g, ln1_w, bqkv, ln2_w,
                        wqkv[l], wo[l], wgu[l], wdn[l])
    return _rmsnorm(x, final_ln_w)


# --------------------------------- main ---------------------------------------
if __name__ == "__main__":
    key = jax.random.PRNGKey(0)
    key, k_x = jax.random.split(key)
    hidden_states = jax.random.normal(k_x, (T, HIDDEN), dtype=jnp.float32)
    position_ids = jnp.arange(T, dtype=jnp.int32)

    params = init_params(key)

    out = jax.block_until_ready(glm_transformer(hidden_states, position_ids, params))
    ref = jax.block_until_ready(glm_transformer_ref(hidden_states, position_ids, params))

    assert out.shape == (T, HIDDEN) and out.dtype == jnp.float32
    np.testing.assert_allclose(np.asarray(out), np.asarray(ref),
                               rtol=2e-3, atol=2e-3)
    print("KERNEL_OK")
</pallas_src>

<mosaic_0001>
module attributes {stable_mosaic.version = 11 : i64} {
  func.func @glm_fused_kernel(%arg0: memref<8x32xf32, #tpu.memory_space<vmem>>, %arg1: memref<8x96xf32, #tpu.memory_space<vmem>>, %arg2: memref<8x48xf32, #tpu.memory_space<vmem>>, %arg3: memref<1x32xf32, #tpu.memory_space<vmem>>, %arg4: memref<2x1x128xf32, #tpu.memory_space<vmem>>, %arg5: memref<2x32x64xf32, #tpu.memory_space<vmem>>, %arg6: memref<2x32x32xf32, #tpu.memory_space<vmem>>, %arg7: memref<2x32x128xf32, #tpu.memory_space<vmem>>, %arg8: memref<2x64x32xf32, #tpu.memory_space<vmem>>, %arg9: memref<8x32xf32, #tpu.memory_space<vmem>>) attributes {dimension_semantics = [], scalar_prefetch = 0 : i64, scratch_operands = 0 : i64, tpu.core_type = #tpu.core_type<tc>} {
    %c0 = arith.constant 0 : index
    %c0_0 = arith.constant 0 : index
    %0 = vector.load %arg0[%c0, %c0_0] : memref<8x32xf32, #tpu.memory_space<vmem>>, vector<8x32xf32>
    %c0_1 = arith.constant 0 : index
    %c0_2 = arith.constant 0 : index
    %1 = vector.load %arg1[%c0_1, %c0_2] : memref<8x96xf32, #tpu.memory_space<vmem>>, vector<8x96xf32>
    %c0_3 = arith.constant 0 : index
    %c0_4 = arith.constant 0 : index
    %2 = vector.load %arg2[%c0_3, %c0_4] : memref<8x48xf32, #tpu.memory_space<vmem>>, vector<8x48xf32>
    %3 = tpu.iota {dimensions = array<i32: 0>} : vector<8x8xi32>
    %4 = tpu.iota {dimensions = array<i32: 1>} : vector<8x8xi32>
    %5 = arith.cmpi sge, %3, %4 : vector<8x8xi32>
    %6 = tpu.concatenate %5, %5 in 0 : vector<8x8xi1>, vector<8x8xi1> -> vector<16x8xi1>
    %c0_i32 = arith.constant 0 : i32
    %7 = arith.index_cast %c0_i32 : i32 to index
    %c0_5 = arith.constant 0 : index
    %c0_6 = arith.constant 0 : index
    %8 = vector.load %arg4[%7, %c0_5, %c0_6] : memref<2x1x128xf32, #tpu.memory_space<vmem>>, vector<1x1x128xf32>
    %9 = vector.shape_cast %8 : vector<1x1x128xf32> to vector<1x128xf32>
    %10 = vector.extract_strided_slice %9 {offsets = [0, 0], sizes = [1, 32], strides = [1, 1]} : vector<1x128xf32> to vector<1x32xf32>
    %11 = vector.extract_strided_slice %9 {offsets = [0, 32], sizes = [1, 32], strides = [1, 1]} : vector<1x128xf32> to vector<1x32xf32>
    %12 = vector.extract_strided_slice %9 {offsets = [0, 64], sizes = [1, 64], strides = [1, 1]} : vector<1x128xf32> to vector<1x64xf32>
    %13 = arith.index_cast %c0_i32 : i32 to index
    %c0_7 = arith.constant 0 : index
    %c0_8 = arith.constant 0 : index
    %14 = vector.load %arg5[%13, %c0_7, %c0_8] : memref<2x32x64xf32, #tpu.memory_space<vmem>>, vector<1x32x64xf32>
    %15 = vector.shape_cast %14 : vector<1x32x64xf32> to vector<32x64xf32>
    %16 = arith.index_cast %c0_i32 : i32 to index
    %c0_9 = arith.constant 0 : index
    %c0_10 = arith.constant 0 : index
    %17 = vector.load %arg6[%16, %c0_9, %c0_10] : memref<2x32x32xf32, #tpu.memory_space<vmem>>, vector<1x32x32xf32>
    %18 = vector.shape_cast %17 : vector<1x32x32xf32> to vector<32x32xf32>
    %19 = arith.index_cast %c0_i32 : i32 to index
    %c0_11 = arith.constant 0 : index
    %c0_12 = arith.constant 0 : index
    %20 = vector.load %arg7[%19, %c0_11, %c0_12] : memref<2x32x128xf32, #tpu.memory_space<vmem>>, vector<1x32x128xf32>
    %21 = vector.shape_cast %20 : vector<1x32x128xf32> to vector<32x128xf32>
    %22 = arith.index_cast %c0_i32 : i32 to index
    %c0_13 = arith.constant 0 : index
    %c0_14 = arith.constant 0 : index
    %23 = vector.load %arg8[%22, %c0_13, %c0_14] : memref<2x64x32xf32, #tpu.memory_space<vmem>>, vector<1x64x32xf32>
    %24 = vector.shape_cast %23 : vector<1x64x32xf32> to vector<64x32xf32>
    %25 = arith.mulf %0, %0 : vector<8x32xf32>
    %cst = arith.constant dense<0.000000e+00> : vector<8xf32>
    %26 = vector.multi_reduction <add>, %25, %cst [1] : vector<8x32xf32> to vector<8xf32>
    %27 = vector.shape_cast %26 : vector<8xf32> to vector<8x1xf32>
    %cst_15 = arith.constant 3.200000e+01 : f32
    %28 = vector.broadcast %cst_15 : f32 to vector<8x1xf32>
    %29 = arith.divf %27, %28 : vector<8x1xf32>
    %cst_16 = arith.constant 9.99999974E-6 : f32
    %30 = vector.broadcast %cst_16 : f32 to vector<8x1xf32>
    %31 = arith.addf %29, %30 : vector<8x1xf32>
    %32 = math.rsqrt %31 : vector<8x1xf32>
    %33 = vector.broadcast %32 : vector<8x1xf32> to vector<8x32xf32>
    %34 = arith.mulf %0, %33 : vector<8x32xf32>
    %35 = vector.broadcast %10 : vector<1x32xf32> to vector<8x32xf32>
    %36 = arith.mulf %34, %35 : vector<8x32xf32>
    %cst_17 = arith.constant dense<0.000000e+00> : vector<8x64xf32>
    %37 = tpu.matmul %36, %15, %cst_17 {dimension_numbers = #tpu.dot_dimension_numbers<[1], [0], [0], [1], [0, 0, 1, 1], [], []>} : vector<8x32xf32>, vector<32x64xf32>, vector<8x64xf32> -> vector<8x64xf32>
    %38 = vector.broadcast %12 : vector<1x64xf32> to vector<8x64xf32>
    %39 = arith.addf %37, %38 : vector<8x64xf32>
    %40 = vector.extract_strided_slice %39 {offsets = [0, 0], sizes = [8, 32], strides = [1, 1]} : vector<8x64xf32> to vector<8x32xf32>
    %41 = vector.extract_strided_slice %39 {offsets = [0, 32], sizes = [8, 16], strides = [1, 1]} : vector<8x64xf32> to vector<8x16xf32>
    %42 = vector.extract_strided_slice %39 {offsets = [0, 48], sizes = [8, 16], strides = [1, 1]} : vector<8x64xf32> to vector<8x16xf32>
    %43 = vector.extract_strided_slice %1 {offsets = [0, 0], sizes = [8, 32], strides = [1, 1]} : vector<8x96xf32> to vector<8x32xf32>
    %44 = vector.extract_strided_slice %1 {offsets = [0, 32], sizes = [8, 32], strides = [1, 1]} : vector<8x96xf32> to vector<8x32xf32>
    %45 = vector.extract_strided_slice %1 {offsets = [0, 64], sizes = [8, 32], strides = [1, 1]} : vector<8x96xf32> to vector<8x32xf32>
    %46 = vector.extract_strided_slice %2 {offsets = [0, 0], sizes = [8, 16], strides = [1, 1]} : vector<8x48xf32> to vector<8x16xf32>
    %47 = vector.extract_strided_slice %2 {offsets = [0, 16], sizes = [8, 16], strides = [1, 1]} : vector<8x48xf32> to vector<8x16xf32>
    %48 = vector.extract_strided_slice %2 {offsets = [0, 32], sizes = [8, 16], strides = [1, 1]} : vector<8x48xf32> to vector<8x16xf32>
    %49 = arith.mulf %40, %43 : vector<8x32xf32>
    %50 = vector.extract_strided_slice %40 {offsets = [0, 1], sizes = [8, 31], strides = [1, 1]} : vector<8x32xf32> to vector<8x31xf32>
    %51 = vector.extract_strided_slice %40 {offsets = [0, 0], sizes = [8, 1], strides = [1, 1]} : vector<8x32xf32> to vector<8x1xf32>
    %52 = tpu.concatenate %50, %51 in 1 : vector<8x31xf32>, vector<8x1xf32> -> vector<8x32xf32>
    %53 = arith.mulf %52, %44 : vector<8x32xf32>
    %54 = arith.addf %49, %53 : vector<8x32xf32>
    %55 = vector.extract_strided_slice %40 {offsets = [0, 31], sizes = [8, 1], strides = [1, 1]} : vector<8x32xf32> to vector<8x1xf32>
    %56 = vector.extract_strided_slice %40 {offsets = [0, 0], sizes = [8, 31], strides = [1, 1]} : vector<8x32xf32> to vector<8x31xf32>
    %57 = tpu.concatenate %55, %56 in 1 : vector<8x1xf32>, vector<8x31xf32> -> vector<8x32xf32>
    %58 = arith.mulf %57, %45 : vector<8x32xf32>
    %59 = arith.addf %54, %58 : vector<8x32xf32>
    %60 = arith.mulf %41, %46 : vector<8x16xf32>
    %61 = vector.extract_strided_slice %41 {offsets = [0, 1], sizes = [8, 15], strides = [1, 1]} : vector<8x16xf32> to vector<8x15xf32>
    %62 = vector.extract_strided_slice %41 {offsets = [0, 0], sizes = [8, 1], strides = [1, 1]} : vector<8x16xf32> to vector<8x1xf32>
    %63 = tpu.concatenate %61, %62 in 1 : vector<8x15xf32>, vector<8x1xf32> -> vector<8x16xf32>
    %64 = arith.mulf %63, %47 : vector<8x16xf32>
    %65 = arith.addf %60, %64 : vector<8x16xf32>
    %66 = vector.extract_strided_slice %41 {offsets = [0, 15], sizes = [8, 1], strides = [1, 1]} : vector<8x16xf32> to vector<8x1xf32>
    %67 = vector.extract_strided_slice %41 {offsets = [0, 0], sizes = [8, 15], strides = [1, 1]} : vector<8x16xf32> to vector<8x15xf32>
    %68 = tpu.concatenate %66, %67 in 1 : vector<8x1xf32>, vector<8x15xf32> -> vector<8x16xf32>
    %69 = arith.mulf %68, %48 : vector<8x16xf32>
    %70 = arith.addf %65, %69 : vector<8x16xf32>
    %71 = vector.extract_strided_slice %59 {offsets = [0, 0], sizes = [8, 8], strides = [1, 1]} : vector<8x32xf32> to vector<8x8xf32>
    %72 = vector.extract_strided_slice %59 {offsets = [0, 8], sizes = [8, 8], strides = [1, 1]} : vector<8x32xf32> to vector<8x8xf32>
    %73 = tpu.concatenate %71, %72 in 0 : vector<8x8xf32>, vector<8x8xf32> -> vector<16x8xf32>
    %74 = vector.extract_strided_slice %59 {offsets = [0, 16], sizes = [8, 8], strides = [1, 1]} : vector<8x32xf32> to vector<8x8xf32>
    %75 = vector.extract_strided_slice %59 {offsets = [0, 24], sizes = [8, 8], strides = [1, 1]} : vector<8x32xf32> to vector<8x8xf32>
    %76 = tpu.concatenate %74, %75 in 0 : vector<8x8xf32>, vector<8x8xf32> -> vector<16x8xf32>
    %77 = vector.shape_cast %73 : vector<16x8xf32> to vector<1x16x8xf32>
    %78 = vector.shape_cast %76 : vector<16x8xf32> to vector<1x16x8xf32>
    %79 = tpu.concatenate %77, %78 in 0 : vector<1x16x8xf32>, vector<1x16x8xf32> -> vector<2x16x8xf32>
    %80 = vector.extract_strided_slice %70 {offsets = [0, 0], sizes = [8, 8], strides = [1, 1]} : vector<8x16xf32> to vector<8x8xf32>
    %81 = vector.extract_strided_slice %70 {offsets = [0, 8], sizes = [8, 8], strides = [1, 1]} : vector<8x16xf32> to vector<8x8xf32>
    %82 = vector.shape_cast %80 : vector<8x8xf32> to vector<1x8x8xf32>
    %83 = vector.shape_cast %81 : vector<8x8xf32> to vector<1x8x8xf32>
    %84 = tpu.concatenate %82, %83 in 0 : vector<1x8x8xf32>, vector<1x8x8xf32> -> vector<2x8x8xf32>
    %85 = vector.extract_strided_slice %42 {offsets = [0, 0], sizes = [8, 8], strides = [1, 1]} : vector<8x16xf32> to vector<8x8xf32>
    %86 = vector.extract_strided_slice %42 {offsets = [0, 8], sizes = [8, 8], strides = [1, 1]} : vector<8x16xf32> to vector<8x8xf32>
    %87 = vector.shape_cast %85 : vector<8x8xf32> to vector<1x8x8xf32>
    %88 = vector.shape_cast %86 : vector<8x8xf32> to vector<1x8x8xf32>
    %89 = tpu.concatenate %87, %88 in 0 : vector<1x8x8xf32>, vector<1x8x8xf32> -> vector<2x8x8xf32>
    "tpu.trace_start"() <{level = 10 : i32, message = "kmd,ksd->kms"}> : () -> ()
    %cst_18 = arith.constant dense<0.000000e+00> : vector<2x16x8xf32>
    %90 = tpu.matmul %79, %84, %cst_18 {dimension_numbers = #tpu.dot_dimension_numbers<[2], [2], [1], [1], [0, 0, 0, 1, 1, 1], [0], [0]>} : vector<2x16x8xf32>, vector<2x8x8xf32>, vector<2x16x8xf32> -> vector<2x16x8xf32>
    "tpu.trace_stop"() : () -> ()
    %91 = vector.shape_cast %6 : vector<16x8xi1> to vector<1x16x8xi1>
    %cst_19 = arith.constant -1.000000e+30 : f32
    %92 = vector.shape_cast %91 : vector<1x16x8xi1> to vector<1x16x8xi1>
    %93 = vector.broadcast %92 : vector<1x16x8xi1> to vector<2x16x8xi1>
    %94 = vector.broadcast %cst_19 : f32 to vector<2x16x8xf32>
    %95 = arith.select %93, %90, %94 : vector<2x16x8xi1>, vector<2x16x8xf32>
    %cst_20 = arith.constant dense<0xFF800000> : vector<2x16xf32>
    %96 = vector.multi_reduction <maximumf>, %95, %cst_20 [2] : vector<2x16x8xf32> to vector<2x16xf32>
    %97 = vector.shape_cast %96 : vector<2x16xf32> to vector<2x16x1xf32>
    %98 = vector.broadcast %97 : vector<2x16x1xf32> to vector<2x16x8xf32>
    %99 = arith.subf %95, %98 : vector<2x16x8xf32>
    %100 = math.exp %99 : vector<2x16x8xf32>
    %cst_21 = arith.constant dense<0.000000e+00> : vector<2x16xf32>
    %101 = vector.multi_reduction <add>, %100, %cst_21 [2] : vector<2x16x8xf32> to vector<2x16xf32>
    %102 = vector.shape_cast %101 : vector<2x16xf32> to vector<2x16x1xf32>
    "tpu.trace_start"() <{level = 10 : i32, message = "kms,ksd->kmd"}> : () -> ()
    %cst_22 = arith.constant dense<0.000000e+00> : vector<2x16x8xf32>
    %103 = tpu.matmul %100, %89, %cst_22 {dimension_numbers = #tpu.dot_dimension_numbers<[2], [1], [1], [2], [0, 0, 0, 1, 1, 2], [0], [0]>} : vector<2x16x8xf32>, vector<2x8x8xf32>, vector<2x16x8xf32> -> vector<2x16x8xf32>
    "tpu.trace_stop"() : () -> ()
    %104 = tpu.reciprocal %102 {approx = true} : vector<2x16x1xf32> -> vector<2x16x1xf32>
    %105 = vector.broadcast %104 : vector<2x16x1xf32> to vector<2x16x8xf32>
    %106 = arith.mulf %103, %105 : vector<2x16x8xf32>
    %107 = vector.extract_strided_slice %106 {offsets = [0, 0, 0], sizes = [1, 8, 8], strides = [1, 1, 1]} : vector<2x16x8xf32> to vector<1x8x8xf32>
    %108 = vector.shape_cast %107 : vector<1x8x8xf32> to vector<8x8xf32>
    %109 = vector.extract_strided_slice %106 {offsets = [0, 8, 0], sizes = [1, 8, 8], strides = [1, 1, 1]} : vector<2x16x8xf32> to vector<1x8x8xf32>
    %110 = vector.shape_cast %109 : vector<1x8x8xf32> to vector<8x8xf32>
    %111 = vector.extract_strided_slice %106 {offsets = [1, 0, 0], sizes = [1, 8, 8], strides = [1, 1, 1]} : vector<2x16x8xf32> to vector<1x8x8xf32>
    %112 = vector.shape_cast %111 : vector<1x8x8xf32> to vector<8x8xf32>
    %113 = vector.extract_strided_slice %106 {offsets = [1, 8, 0], sizes = [1, 8, 8], strides = [1, 1, 1]} : vector<2x16x8xf32> to vector<1x8x8xf32>
    %114 = vector.shape_cast %113 : vector<1x8x8xf32> to vector<8x8xf32>
    %115 = tpu.concatenate %108, %110, %112, %114 in 1 : vector<8x8xf32>, vector<8x8xf32>, vector<8x8xf32>, vector<8x8xf32> -> vector<8x32xf32>
    %cst_23 = arith.constant dense<0.000000e+00> : vector<8x32xf32>
    %116 = tpu.matmul %115, %18, %cst_23 {dimension_numbers = #tpu.dot_dimension_numbers<[1], [0], [0], [1], [0, 0, 1, 1], [], []>} : vector<8x32xf32>, vector<32x32xf32>, vector<8x32xf32> -> vector<8x32xf32>
    %117 = arith.addf %0, %116 : vector<8x32xf32>
    %118 = arith.mulf %117, %117 : vector<8x32xf32>
    %cst_24 = arith.constant dense<0.000000e+00> : vector<8xf32>
    %119 = vector.multi_reduction <add>, %118, %cst_24 [1] : vector<8x32xf32> to vector<8xf32>
    %120 = vector.shape_cast %119 : vector<8xf32> to vector<8x1xf32>
    %cst_25 = arith.constant 3.200000e+01 : f32
    %121 = vector.broadcast %cst_25 : f32 to vector<8x1xf32>
    %122 = arith.divf %120, %121 : vector<8x1xf32>
    %cst_26 = arith.constant 9.99999974E-6 : f32
    %123 = vector.broadcast %cst_26 : f32 to vector<8x1xf32>
    %124 = arith.addf %122, %123 : vector<8x1xf32>
    %125 = math.rsqrt %124 : vector<8x1xf32>
    %126 = vector.broadcast %125 : vector<8x1xf32> to vector<8x32xf32>
    %127 = arith.mulf %117, %126 : vector<8x32xf32>
    %128 = vector.broadcast %11 : vector<1x32xf32> to vector<8x32xf32>
    %129 = arith.mulf %127, %128 : vector<8x32xf32>
    %cst_27 = arith.constant dense<0.000000e+00> : vector<8x128xf32>
    %130 = tpu.matmul %129, %21, %cst_27 {dimension_numbers = #tpu.dot_dimension_numbers<[1], [0], [0], [1], [0, 0, 1, 1], [], []>} : vector<8x32xf32>, vector<32x128xf32>, vector<8x128xf32> -> vector<8x128xf32>
    %131 = vector.extract_strided_slice %130 {offsets = [0, 0], sizes = [8, 64], strides = [1, 1]} : vector<8x128xf32> to vector<8x64xf32>
    %132 = vector.extract_strided_slice %130 {offsets = [0, 64], sizes = [8, 64], strides = [1, 1]} : vector<8x128xf32> to vector<8x64xf32>
    %133 = arith.negf %131 : vector<8x64xf32>
    %134 = math.exp %133 : vector<8x64xf32>
    %cst_28 = arith.constant 1.000000e+00 : f32
    %135 = vector.broadcast %cst_28 : f32 to vector<8x64xf32>
    %136 = arith.addf %135, %134 : vector<8x64xf32>
    %137 = arith.divf %135, %136 : vector<8x64xf32>
    %138 = arith.mulf %131, %137 : vector<8x64xf32>
    %139 = arith.mulf %138, %132 : vector<8x64xf32>
    %cst_29 = arith.constant dense<0.000000e+00> : vector<8x32xf32>
    %140 = tpu.matmul %139, %24, %cst_29 {dimension_numbers = #tpu.dot_dimension_numbers<[1], [0], [0], [1], [0, 0, 1, 1], [], []>} : vector<8x64xf32>, vector<64x32xf32>, vector<8x32xf32> -> vector<8x32xf32>
    %141 = arith.addf %140, %117 : vector<8x32xf32>
    %c1_i32 = arith.constant 1 : i32
    %142 = arith.index_cast %c1_i32 : i32 to index
    %c0_30 = arith.constant 0 : index
    %c0_31 = arith.constant 0 : index
    %143 = vector.load %arg4[%142, %c0_30, %c0_31] : memref<2x1x128xf32, #tpu.memory_space<vmem>>, vector<1x1x128xf32>
    %144 = vector.shape_cast %143 : vector<1x1x128xf32> to vector<1x128xf32>
    %145 = vector.extract_strided_slice %144 {offsets = [0, 0], sizes = [1, 32], strides = [1, 1]} : vector<1x128xf32> to vector<1x32xf32>
    %146 = vector.extract_strided_slice %144 {offsets = [0, 32], sizes = [1, 32], strides = [1, 1]} : vector<1x128xf32> to vector<1x32xf32>
    %147 = vector.extract_strided_slice %144 {offsets = [0, 64], sizes = [1, 64], strides = [1, 1]} : vector<1x128xf32> to vector<1x64xf32>
    %148 = arith.index_cast %c1_i32 : i32 to index
    %c0_32 = arith.constant 0 : index
    %c0_33 = arith.constant 0 : index
    %149 = vector.load %arg5[%148, %c0_32, %c0_33] : memref<2x32x64xf32, #tpu.memory_space<vmem>>, vector<1x32x64xf32>
    %150 = vector.shape_cast %149 : vector<1x32x64xf32> to vector<32x64xf32>
    %151 = arith.index_cast %c1_i32 : i32 to index
    %c0_34 = arith.constant 0 : index
    %c0_35 = arith.constant 0 : index
    %152 = vector.load %arg6[%151, %c0_34, %c0_35] : memref<2x32x32xf32, #tpu.memory_space<vmem>>, vector<1x32x32xf32>
    %153 = vector.shape_cast %152 : vector<1x32x32xf32> to vector<32x32xf32>
    %154 = arith.index_cast %c1_i32 : i32 to index
    %c0_36 = arith.constant 0 : index
    %c0_37 = arith.constant 0 : index
    %155 = vector.load %arg7[%154, %c0_36, %c0_37] : memref<2x32x128xf32, #tpu.memory_space<vmem>>, vector<1x32x128xf32>
    %156 = vector.shape_cast %155 : vector<1x32x128xf32> to vector<32x128xf32>
    %157 = arith.index_cast %c1_i32 : i32 to index
    %c0_38 = arith.constant 0 : index
    %c0_39 = arith.constant 0 : index
    %158 = vector.load %arg8[%157, %c0_38, %c0_39] : memref<2x64x32xf32, #tpu.memory_space<vmem>>, vector<1x64x32xf32>
    %159 = vector.shape_cast %158 : vector<1x64x32xf32> to vector<64x32xf32>
    %160 = arith.mulf %141, %141 : vector<8x32xf32>
    %cst_40 = arith.constant dense<0.000000e+00> : vector<8xf32>
    %161 = vector.multi_reduction <add>, %160, %cst_40 [1] : vector<8x32xf32> to vector<8xf32>
    %162 = vector.shape_cast %161 : vector<8xf32> to vector<8x1xf32>
    %cst_41 = arith.constant 3.200000e+01 : f32
    %163 = vector.broadcast %cst_41 : f32 to vector<8x1xf32>
    %164 = arith.divf %162, %163 : vector<8x1xf32>
    %cst_42 = arith.constant 9.99999974E-6 : f32
    %165 = vector.broadcast %cst_42 : f32 to vector<8x1xf32>
    %166 = arith.addf %164, %165 : vector<8x1xf32>
    %167 = math.rsqrt %166 : vector<8x1xf32>
    %168 = vector.broadcast %167 : vector<8x1xf32> to vector<8x32xf32>
    %169 = arith.mulf %141, %168 : vector<8x32xf32>
    %170 = vector.broadcast %145 : vector<1x32xf32> to vector<8x32xf32>
    %171 = arith.mulf %169, %170 : vector<8x32xf32>
    %cst_43 = arith.constant dense<0.000000e+00> : vector<8x64xf32>
    %172 = tpu.matmul %171, %150, %cst_43 {dimension_numbers = #tpu.dot_dimension_numbers<[1], [0], [0], [1], [0, 0, 1, 1], [], []>} : vector<8x32xf32>, vector<32x64xf32>, vector<8x64xf32> -> vector<8x64xf32>
    %173 = vector.broadcast %147 : vector<1x64xf32> to vector<8x64xf32>
    %174 = arith.addf %172, %173 : vector<8x64xf32>
    %175 = vector.extract_strided_slice %174 {offsets = [0, 0], sizes = [8, 32], strides = [1, 1]} : vector<8x64xf32> to vector<8x32xf32>
    %176 = vector.extract_strided_slice %174 {offsets = [0, 32], sizes = [8, 16], strides = [1, 1]} : vector<8x64xf32> to vector<8x16xf32>
    %177 = vector.extract_strided_slice %174 {offsets = [0, 48], sizes = [8, 16], strides = [1, 1]} : vector<8x64xf32> to vector<8x16xf32>
    %178 = vector.extract_strided_slice %1 {offsets = [0, 0], sizes = [8, 32], strides = [1, 1]} : vector<8x96xf32> to vector<8x32xf32>
    %179 = vector.extract_strided_slice %1 {offsets = [0, 32], sizes = [8, 32], strides = [1, 1]} : vector<8x96xf32> to vector<8x32xf32>
    %180 = vector.extract_strided_slice %1 {offsets = [0, 64], sizes = [8, 32], strides = [1, 1]} : vector<8x96xf32> to vector<8x32xf32>
    %181 = vector.extract_strided_slice %2 {offsets = [0, 0], sizes = [8, 16], strides = [1, 1]} : vector<8x48xf32> to vector<8x16xf32>
    %182 = vector.extract_strided_slice %2 {offsets = [0, 16], sizes = [8, 16], strides = [1, 1]} : vector<8x48xf32> to vector<8x16xf32>
    %183 = vector.extract_strided_slice %2 {offsets = [0, 32], sizes = [8, 16], strides = [1, 1]} : vector<8x48xf32> to vector<8x16xf32>
    %184 = arith.mulf %175, %178 : vector<8x32xf32>
    %185 = vector.extract_strided_slice %175 {offsets = [0, 1], sizes = [8, 31], strides = [1, 1]} : vector<8x32xf32> to vector<8x31xf32>
    %186 = vector.extract_strided_slice %175 {offsets = [0, 0], sizes = [8, 1], strides = [1, 1]} : vector<8x32xf32> to vector<8x1xf32>
    %187 = tpu.concatenate %185, %186 in 1 : vector<8x31xf32>, vector<8x1xf32> -> vector<8x32xf32>
    %188 = arith.mulf %187, %179 : vector<8x32xf32>
    %189 = arith.addf %184, %188 : vector<8x32xf32>
    %190 = vector.extract_strided_slice %175 {offsets = [0, 31], sizes = [8, 1], strides = [1, 1]} : vector<8x32xf32> to vector<8x1xf32>
    %191 = vector.extract_strided_slice %175 {offsets = [0, 0], sizes = [8, 31], strides = [1, 1]} : vector<8x32xf32> to vector<8x31xf32>
    %192 = tpu.concatenate %190, %191 in 1 : vector<8x1xf32>, vector<8x31xf32> -> vector<8x32xf32>
    %193 = arith.mulf %192, %180 : vector<8x32xf32>
    %194 = arith.addf %189, %193 : vector<8x32xf32>
    %195 = arith.mulf %176, %181 : vector<8x16xf32>
    %196 = vector.extract_strided_slice %176 {offsets = [0, 1], sizes = [8, 15], strides = [1, 1]} : vector<8x16xf32> to vector<8x15xf32>
    %197 = vector.extract_strided_slice %176 {offsets = [0, 0], sizes = [8, 1], strides = [1, 1]} : vector<8x16xf32> to vector<8x1xf32>
    %198 = tpu.concatenate %196, %197 in 1 : vector<8x15xf32>, vector<8x1xf32> -> vector<8x16xf32>
    %199 = arith.mulf %198, %182 : vector<8x16xf32>
    %200 = arith.addf %195, %199 : vector<8x16xf32>
    %201 = vector.extract_strided_slice %176 {offsets = [0, 15], sizes = [8, 1], strides = [1, 1]} : vector<8x16xf32> to vector<8x1xf32>
    %202 = vector.extract_strided_slice %176 {offsets = [0, 0], sizes = [8, 15], strides = [1, 1]} : vector<8x16xf32> to vector<8x15xf32>
    %203 = tpu.concatenate %201, %202 in 1 : vector<8x1xf32>, vector<8x15xf32> -> vector<8x16xf32>
    %204 = arith.mulf %203, %183 : vector<8x16xf32>
    %205 = arith.addf %200, %204 : vector<8x16xf32>
    %206 = vector.extract_strided_slice %194 {offsets = [0, 0], sizes = [8, 8], strides = [1, 1]} : vector<8x32xf32> to vector<8x8xf32>
    %207 = vector.extract_strided_slice %194 {offsets = [0, 8], sizes = [8, 8], strides = [1, 1]} : vector<8x32xf32> to vector<8x8xf32>
    %208 = tpu.concatenate %206, %207 in 0 : vector<8x8xf32>, vector<8x8xf32> -> vector<16x8xf32>
    %209 = vector.extract_strided_slice %194 {offsets = [0, 16], sizes = [8, 8], strides = [1, 1]} : vector<8x32xf32> to vector<8x8xf32>
    %210 = vector.extract_strided_slice %194 {offsets = [0, 24], sizes = [8, 8], strides = [1, 1]} : vector<8x32xf32> to vector<8x8xf32>
    %211 = tpu.concatenate %209, %210 in 0 : vector<8x8xf32>, vector<8x8xf32> -> vector<16x8xf32>
    %212 = vector.shape_cast %208 : vector<16x8xf32> to vector<1x16x8xf32>
    %213 = vector.shape_cast %211 : vector<16x8xf32> to vector<1x16x8xf32>
    %214 = tpu.concatenate %212, %213 in 0 : vector<1x16x8xf32>, vector<1x16x8xf32> -> vector<2x16x8xf32>
    %215 = vector.extract_strided_slice %205 {offsets = [0, 0], sizes = [8, 8], strides = [1, 1]} : vector<8x16xf32> to vector<8x8xf32>
    %216 = vector.extract_strided_slice %205 {offsets = [0, 8], sizes = [8, 8], strides = [1, 1]} : vector<8x16xf32> to vector<8x8xf32>
    %217 = vector.shape_cast %215 : vector<8x8xf32> to vector<1x8x8xf32>
    %218 = vector.shape_cast %216 : vector<8x8xf32> to vector<1x8x8xf32>
    %219 = tpu.concatenate %217, %218 in 0 : vector<1x8x8xf32>, vector<1x8x8xf32> -> vector<2x8x8xf32>
    %220 = vector.extract_strided_slice %177 {offsets = [0, 0], sizes = [8, 8], strides = [1, 1]} : vector<8x16xf32> to vector<8x8xf32>
    %221 = vector.extract_strided_slice %177 {offsets = [0, 8], sizes = [8, 8], strides = [1, 1]} : vector<8x16xf32> to vector<8x8xf32>
    %222 = vector.shape_cast %220 : vector<8x8xf32> to vector<1x8x8xf32>
    %223 = vector.shape_cast %221 : vector<8x8xf32> to vector<1x8x8xf32>
    %224 = tpu.concatenate %222, %223 in 0 : vector<1x8x8xf32>, vector<1x8x8xf32> -> vector<2x8x8xf32>
    "tpu.trace_start"() <{level = 10 : i32, message = "kmd,ksd->kms"}> : () -> ()
    %cst_44 = arith.constant dense<0.000000e+00> : vector<2x16x8xf32>
    %225 = tpu.matmul %214, %219, %cst_44 {dimension_numbers = #tpu.dot_dimension_numbers<[2], [2], [1], [1], [0, 0, 0, 1, 1, 1], [0], [0]>} : vector<2x16x8xf32>, vector<2x8x8xf32>, vector<2x16x8xf32> -> vector<2x16x8xf32>
    "tpu.trace_stop"() : () -> ()
    %226 = vector.shape_cast %6 : vector<16x8xi1> to vector<1x16x8xi1>
    %cst_45 = arith.constant -1.000000e+30 : f32
    %227 = vector.shape_cast %226 : vector<1x16x8xi1> to vector<1x16x8xi1>
    %228 = vector.broadcast %227 : vector<1x16x8xi1> to vector<2x16x8xi1>
    %229 = vector.broadcast %cst_45 : f32 to vector<2x16x8xf32>
    %230 = arith.select %228, %225, %229 : vector<2x16x8xi1>, vector<2x16x8xf32>
    %cst_46 = arith.constant dense<0xFF800000> : vector<2x16xf32>
    %231 = vector.multi_reduction <maximumf>, %230, %cst_46 [2] : vector<2x16x8xf32> to vector<2x16xf32>
    %232 = vector.shape_cast %231 : vector<2x16xf32> to vector<2x16x1xf32>
    %233 = vector.broadcast %232 : vector<2x16x1xf32> to vector<2x16x8xf32>
    %234 = arith.subf %230, %233 : vector<2x16x8xf32>
    %235 = math.exp %234 : vector<2x16x8xf32>
    %cst_47 = arith.constant dense<0.000000e+00> : vector<2x16xf32>
    %236 = vector.multi_reduction <add>, %235, %cst_47 [2] : vector<2x16x8xf32> to vector<2x16xf32>
    %237 = vector.shape_cast %236 : vector<2x16xf32> to vector<2x16x1xf32>
    "tpu.trace_start"() <{level = 10 : i32, message = "kms,ksd->kmd"}> : () -> ()
    %cst_48 = arith.constant dense<0.000000e+00> : vector<2x16x8xf32>
    %238 = tpu.matmul %235, %224, %cst_48 {dimension_numbers = #tpu.dot_dimension_numbers<[2], [1], [1], [2], [0, 0, 0, 1, 1, 2], [0], [0]>} : vector<2x16x8xf32>, vector<2x8x8xf32>, vector<2x16x8xf32> -> vector<2x16x8xf32>
    "tpu.trace_stop"() : () -> ()
    %239 = tpu.reciprocal %237 {approx = true} : vector<2x16x1xf32> -> vector<2x16x1xf32>
    %240 = vector.broadcast %239 : vector<2x16x1xf32> to vector<2x16x8xf32>
    %241 = arith.mulf %238, %240 : vector<2x16x8xf32>
    %242 = vector.extract_strided_slice %241 {offsets = [0, 0, 0], sizes = [1, 8, 8], strides = [1, 1, 1]} : vector<2x16x8xf32> to vector<1x8x8xf32>
    %243 = vector.shape_cast %242 : vector<1x8x8xf32> to vector<8x8xf32>
    %244 = vector.extract_strided_slice %241 {offsets = [0, 8, 0], sizes = [1, 8, 8], strides = [1, 1, 1]} : vector<2x16x8xf32> to vector<1x8x8xf32>
    %245 = vector.shape_cast %244 : vector<1x8x8xf32> to vector<8x8xf32>
    %246 = vector.extract_strided_slice %241 {offsets = [1, 0, 0], sizes = [1, 8, 8], strides = [1, 1, 1]} : vector<2x16x8xf32> to vector<1x8x8xf32>
    %247 = vector.shape_cast %246 : vector<1x8x8xf32> to vector<8x8xf32>
    %248 = vector.extract_strided_slice %241 {offsets = [1, 8, 0], sizes = [1, 8, 8], strides = [1, 1, 1]} : vector<2x16x8xf32> to vector<1x8x8xf32>
    %249 = vector.shape_cast %248 : vector<1x8x8xf32> to vector<8x8xf32>
    %250 = tpu.concatenate %243, %245, %247, %249 in 1 : vector<8x8xf32>, vector<8x8xf32>, vector<8x8xf32>, vector<8x8xf32> -> vector<8x32xf32>
    %cst_49 = arith.constant dense<0.000000e+00> : vector<8x32xf32>
    %251 = tpu.matmul %250, %153, %cst_49 {dimension_numbers = #tpu.dot_dimension_numbers<[1], [0], [0], [1], [0, 0, 1, 1], [], []>} : vector<8x32xf32>, vector<32x32xf32>, vector<8x32xf32> -> vector<8x32xf32>
    %252 = arith.addf %141, %251 : vector<8x32xf32>
    %253 = arith.mulf %252, %252 : vector<8x32xf32>
    %cst_50 = arith.constant dense<0.000000e+00> : vector<8xf32>
    %254 = vector.multi_reduction <add>, %253, %cst_50 [1] : vector<8x32xf32> to vector<8xf32>
    %255 = vector.shape_cast %254 : vector<8xf32> to vector<8x1xf32>
    %cst_51 = arith.constant 3.200000e+01 : f32
    %256 = vector.broadcast %cst_51 : f32 to vector<8x1xf32>
    %257 = arith.divf %255, %256 : vector<8x1xf32>
    %cst_52 = arith.constant 9.99999974E-6 : f32
    %258 = vector.broadcast %cst_52 : f32 to vector<8x1xf32>
    %259 = arith.addf %257, %258 : vector<8x1xf32>
    %260 = math.rsqrt %259 : vector<8x1xf32>
    %261 = vector.broadcast %260 : vector<8x1xf32> to vector<8x32xf32>
    %262 = arith.mulf %252, %261 : vector<8x32xf32>
    %263 = vector.broadcast %146 : vector<1x32xf32> to vector<8x32xf32>
    %264 = arith.mulf %262, %263 : vector<8x32xf32>
    %cst_53 = arith.constant dense<0.000000e+00> : vector<8x128xf32>
    %265 = tpu.matmul %264, %156, %cst_53 {dimension_numbers = #tpu.dot_dimension_numbers<[1], [0], [0], [1], [0, 0, 1, 1], [], []>} : vector<8x32xf32>, vector<32x128xf32>, vector<8x128xf32> -> vector<8x128xf32>
    %266 = vector.extract_strided_slice %265 {offsets = [0, 0], sizes = [8, 64], strides = [1, 1]} : vector<8x128xf32> to vector<8x64xf32>
    %267 = vector.extract_strided_slice %265 {offsets = [0, 64], sizes = [8, 64], strides = [1, 1]} : vector<8x128xf32> to vector<8x64xf32>
    %268 = arith.negf %266 : vector<8x64xf32>
    %269 = math.exp %268 : vector<8x64xf32>
    %cst_54 = arith.constant 1.000000e+00 : f32
    %270 = vector.broadcast %cst_54 : f32 to vector<8x64xf32>
    %271 = arith.addf %270, %269 : vector<8x64xf32>
    %272 = arith.divf %270, %271 : vector<8x64xf32>
    %273 = arith.mulf %266, %272 : vector<8x64xf32>
    %274 = arith.mulf %273, %267 : vector<8x64xf32>
    %cst_55 = arith.constant dense<0.000000e+00> : vector<8x32xf32>
    %275 = tpu.matmul %274, %159, %cst_55 {dimension_numbers = #tpu.dot_dimension_numbers<[1], [0], [0], [1], [0, 0, 1, 1], [], []>} : vector<8x64xf32>, vector<64x32xf32>, vector<8x32xf32> -> vector<8x32xf32>
    %276 = arith.addf %275, %252 : vector<8x32xf32>
    %c2_i32 = arith.constant 2 : i32
    %c0_56 = arith.constant 0 : index
    %c0_57 = arith.constant 0 : index
    %277 = vector.load %arg3[%c0_56, %c0_57] : memref<1x32xf32, #tpu.memory_space<vmem>>, vector<1x32xf32>
    %278 = arith.mulf %276, %276 : vector<8x32xf32>
    %cst_58 = arith.constant dense<0.000000e+00> : vector<8xf32>
    %279 = vector.multi_reduction <add>, %278, %cst_58 [1] : vector<8x32xf32> to vector<8xf32>
    %280 = vector.shape_cast %279 : vector<8xf32> to vector<8x1xf32>
    %cst_59 = arith.constant 3.200000e+01 : f32
    %281 = vector.broadcast %cst_59 : f32 to vector<8x1xf32>
    %282 = arith.divf %280, %281 : vector<8x1xf32>
    %cst_60 = arith.constant 9.99999974E-6 : f32
    %283 = vector.broadcast %cst_60 : f32 to vector<8x1xf32>
    %284 = arith.addf %282, %283 : vector<8x1xf32>
    %285 = math.rsqrt %284 : vector<8x1xf32>
    %286 = vector.broadcast %285 : vector<8x1xf32> to vector<8x32xf32>
    %287 = arith.mulf %276, %286 : vector<8x32xf32>
    %288 = vector.broadcast %277 : vector<1x32xf32> to vector<8x32xf32>
    %289 = arith.mulf %287, %288 : vector<8x32xf32>
    %c0_61 = arith.constant 0 : index
    %c0_62 = arith.constant 0 : index
    %290 = vector.load %arg9[%c0_61, %c0_62] : memref<8x32xf32, #tpu.memory_space<vmem>>, vector<8x32xf32>
    tpu.vector_store %arg9[%c0_61, %c0_62], %289 {strides = array<i32>} : memref<8x32xf32, #tpu.memory_space<vmem>>, vector<8x32xf32>,
    return
  }
}

</mosaic_0001>

<bundles_post_ra>
// kernel: tile.54
= control target key start
LH: loop header
LB: loop body
LE: loop exit
PB: predicated region body
PF: predicated region fallthrough
CT: control target
= control target key end

     0   :  { %vm42_vm0 = vcmask 1047556   ;;  %vm44_vm1 = vcmask 64512   ;;  %vm54_vm2 = vcmask 130112   ;;  %s111_s0 = inlined_call_operand.vmem [shape: f32[8,2,8], index: 0, kind: input, shape index: {}]   ;;  %s112_s1 = inlined_call_operand.vmem [shape: f32[8,16], index: 1, kind: output, shape index: {}]  }
   0x1   :  { %v62_v0 = vld [vmem:[%s111_s0 + $0xe] sm:$0x3]  ;;  %v63_v1 = vld [vmem:[%s111_s0 + $0xc] sm:$0x3]  ;;  %v64_v2 = vld [vmem:[%s111_s0 + $0xa] sm:$0x3] }
   0x2   :  { %8 = vst [vmem:[#allocation0 + $0x38] sm:$0x3] %v62_v0  ;;  %13 = vst [vmem:[#allocation0 + $0x30] sm:$0x3] %v63_v1  ;;  %v65_v3 = vld [vmem:[%s111_s0 + $0x8] sm:$0x3] }
   0x3   :  { %18 = vst [vmem:[#allocation0 + $0x28] sm:$0x3] %v64_v2  ;;  %v66_v4 = vld [vmem:[%s111_s0 + $0x6] sm:$0x3]  ;;  %v67_v5 = vld [vmem:[%s111_s0 + $0x4] sm:$0x3] }
   0x4   :  { %23 = vst [vmem:[#allocation0 + $0x20] sm:$0x3] %v65_v3  ;;  %28 = vst [vmem:[#allocation0 + $0x18] sm:$0x3] %v66_v4  ;;  %v68_v6 = vld [vmem:[%s111_s0 + $0x2] sm:$0x3] }
   0x5   :  { %33 = vst [vmem:[#allocation0 + $0x10] sm:$0x3] %v67_v5  ;;  %v38_v7 = vld [vmem:[%s111_s0] sm:$0x3]  ;;  %37 = vst [vmem:[#allocation0 + $0x8] sm:$0x3] %v68_v6 }
   0x6   :  { %39 = vst [vmem:[#allocation0] sm:$0x3] %v38_v7  ;;  %s70_s0 = smov 8  }
   0xb   :  { %v41_v8 = vld [vmem:[#allocation0] ss:$8 sm:$0xf0]   ;;  %v49_v9 = vld [vmem:[#allocation0 + $0x1] ss:$8 sm:$0xf0]  }
   0xd   :  { %v40_v10 = vld [vmem:[#allocation0] ss:$8 sm:$0xf]   ;;  %v47_v11 = vld [vmem:[#allocation0 + $0x1] ss:$8 sm:$0xf]  }
   0xe   :  { %v43_v12 = vsel %vm42_vm0, %v41_v8, %v40_v10  ;;  %v51_v13 = vsel %vm42_vm0, %v49_v9, %v47_v11 }
   0xf   :  { %52 = vrot.lane.b32.xlu0 %v51_v13, %s70_s0  ;;  %45 = vst.msk [vmem:[%s112_s1] sm:$0xff] %vm44_vm1, %v43_v12  }
  0x81   :  { %v53_v14 = vpop.permute.xlu0 %52  }
  0x82   :  { %55 = vst.msk [vmem:[%s112_s1] sm:$0xff] %vm54_vm2, %v53_v14  }

// kernel: glm_transformer.1
= control target key start
LH: loop header
LB: loop body
LE: loop exit
PB: predicated region body
PF: predicated region fallthrough
CT: control target
= control target key end

     0   :  { %vm63_vm0 = vcmask 261120   ;;  %s2618_s0 = inlined_call_operand.vmem [shape: f32[8,32], index: 0, kind: input, shape index: {}]   ;;  %s2619_s1 = inlined_call_operand.vmem [shape: f32[8,96], index: 1, kind: input, shape index: {}]   ;;  %s2620_s2 = inlined_call_operand.vmem [shape: f32[8,48], index: 2, kind: input, shape index: {}]   ;;  %s2621_s3 = inlined_call_operand.vmem [shape: f32[1,32], index: 3, kind: input, shape index: {}]   ;;  %s2622_s4 = inlined_call_operand.vmem [shape: f32[2,1,128], index: 4, kind: input, shape index: {}]   ;;  %s2623_s5 = inlined_call_operand.vmem [shape: f32[2,32,64], index: 5, kind: input, shape index: {}]   ;;  %s2624_s6 = inlined_call_operand.vmem [shape: f32[2,32,32], index: 6, kind: input, shape index: {}]   ;;  %s2625_s7 = inlined_call_operand.vmem [shape: f32[2,32,128], index: 7, kind: input, shape index: {}]   ;;  %s2626_s8 = inlined_call_operand.vmem [shape: f32[2,64,32], index: 8, kind: input, shape index: {}]   ;;  %s2627_s9 = inlined_call_operand.hbm [shape: f32[8,32], index: 9, kind: output, shape index: {}]  }
   0x1   :  { %v2220_v0 = vld [vmem:[%s2618_s0] sm:$0xff] }
   0x2   :  { %14 = vsyncpa [#allocation3], 0  ;;  %v62_v1 = vmul.f32 %v2220_v0, %v2220_v0  ;;  %v42_v3 = vld [vmem:[%s2623_s5] sm:$0xff]  ;;  %v43_v4 = vld [vmem:[%s2623_s5 + $0x8] sm:$0xff]  ;;  %v2147_v6 = vmov 0.0|0.0   ;;  %vm2148_vm1 = vmmov 0   ;;  %v36_v58 = vlaneseq }
   0x3   :  { %v44_v5 = vld [vmem:[%s2623_s5 + $0x10] sm:$0xff]  ;;  %1993 = vmatprep.subr.bf16.mxu1 %v2147_v6  ;;  %v1994_v7 = vpack.c.bf16 %v43_v4, %v42_v3  ;;  %v45_v8 = vld [vmem:[%s2623_s5 + $0x18] sm:$0xff]  ;;  %v2149_v9 = vmov 0.0   ;;  %v2244_v11 = vld [vmem:[%s2622_s4] ss:$0 sm:$0xff]  ;;  %s2150_s22 = smov 64  }
   0x4   :  { %v64_v2 = vsel %vm63_vm0, %v62_v1, 0.0  ;;  %1857 = vmatprep.mubr.msk.f32.mxu1 %vm2148_vm1, %v2149_v9  ;;  %v1997_v10 = vpack.c.bf16 %v45_v8, %v44_v5  ;;  %v35_v12 = vld [vmem:[%s2620_s2] sm:$0xff]  ;;  %s2151_s23 = smov 112   ;;  %s2152_s2 = smov 31   ;;  %vm195_vm2 = vcmask 121856   ;;  %vm177_vm3 = vcmask 7168  }
   0x5   :  { %65 = vadd.xlane.f32.xlu0 %v64_v2  ;;  %1995 = vmatpush3.bf16.msra.mxu1 %v1994_v7  ;;  %s2153_s24 = smov 95   ;;  %s2154_s25 = smov 111   ;;  %v2272_v23 = vld [vmem:[%s2619_s1] sm:$0xff]  ;;  %vm163_vm4 = vcmask 252928   ;;  %vm233_vm5 = vcmask 64512   ;;  %v37_v59 = vshrl.u32 %v36_v58, 7 }
   0x6   :  { %1996 = vmatprep.subr.bf16.mxu1 %v2147_v6  ;;  %197 = vrot.lane.b32.xlu1 %v35_v12, %s2151_s23  ;;  %s2155_s26 = smov 97   ;;  %s2156_s27 = smov 81   ;;  %v39_v60 = vand.u32 127, %v36_v58  ;;  %vm629_vm7 = vcmask 130048   ;;  %vm631_vm8 = vcmask 195584   ;;  %vm804_vm9 = vcmask 523264  }
   0x7   :  { %s2157_s28 = smov 96   ;;  %s2158_s29 = smov 32  }
   0x8   :  { %s2159_s11 = smov 127   ;;  %s2160_s12 = smov 1   ;;  %vm2322_vm6 = vcmp.ge.s32.totalorder %v37_v59, %v39_v60 }
   0x9   :  { %1998 = vmatpush3.bf16.msra.mxu1 %v1997_v10  ;;  %s2161_s1 = smov 120   ;;  %s2162_s13 = smov 80  }
   0xa   :  { %s2163_s21 = smov 8   ;;  %s2164_s30 = smov 24  }
   0xb   :  { %s2628_s10 = smov 16  }
  0x1b   :  { %79 = vrot.lane.b32.xlu0 %v2244_v11, %s2150_s22 }
  0x78   :  { %v2280_v24 = vpop.permute.xlu1 %197 }
  0x92   :  { %v66_v13 = vpop.xlane.xlu0 %65 }
  0x93   :  { %v68_v14 = vmul.f32 0.03125, %v66_v13 }
  0x95   :  { %v69_v15 = vadd.f32 1e-05, %v68_v14 }
  0x96   :  { %v80_v19 = vpop.permute.xlu0 %79 }
  0x97   :  { %2073 = vrsqrt.f32 %v69_v15 }
  0xa1   :  { %v2074_v16 = vpop.eup %2073 }
  0xa2   :  { %v71_v17 = vmul.f32 %v2074_v16, %v2220_v0 }
  0xa4   :  { %v78_v18 = vmul.f32 %v2244_v11, %v71_v17 }
  0xa6   :  { %1858 = vmatmul.mubr.msk.f32.vlgmr.msra.gmra.mrb[0].mxu1 %vm63_vm0, %v78_v18 }
 0x179   :  { %v151_v20 = vpop.f32.mrb[0].mxu1 }
 0x17a   :  { %v2255_v21 = vadd.f32 %v151_v20, %v80_v19  ;;  %v1859_v22 = vpop.f32.mrb[1].mxu1 }
 0x17c   :  { %160 = vrot.lane.b32.xlu0 %v2255_v21, %s2152_s2  ;;  %189 = vrot.lane.b32.xlu1 %v2255_v21, %s2153_s24  ;;  %v155_v46 = vmul.f32 %v2255_v21, %v2272_v23 }
 0x180   :  { %192 = vrot.lane.b32.xlu1 %v2255_v21, %s2154_s25 }
 0x184   :  { %171 = vrot.lane.b32.xlu1 %v2255_v21, %s2155_s26 }
 0x188   :  { %206 = vrot.lane.b32.xlu1 %v2255_v21, %s2156_s27 }
 0x18c   :  { %210 = vrot.lane.b32.xlu1 %v35_v12, %s2157_s28 }
 0x190   :  { %185 = vrot.lane.b32.xlu1 %v35_v12, %s2158_s29 }
 0x194   :  { %166 = vrot.lane.b32.xlu1 %v2272_v23, %s2157_s28 }
 0x198   :  { %157 = vrot.lane.b32.xlu1 %v2255_v21, %s2159_s11 }
 0x19c   :  { %174 = vrot.lane.b32.xlu1 %v2255_v21, %s2160_s12 }
 0x1ee   :  { %v190_v25 = vpop.permute.xlu1 %189  ;;  %v161_v36 = vpop.permute.xlu0 %160 }
 0x1f2   :  { %v193_v26 = vpop.permute.xlu1 %192 }
 0x1f3   :  { %v196_v27 = vsel %vm195_vm2, %v190_v25, %v193_v26 }
 0x1f4   :  { %v200_v28 = vmul.f32 %v2280_v24, %v196_v27 }
 0x1f6   :  { %202 = vrot.lane.b32.xlu0 %v200_v28, %s2158_s29  ;;  %v172_v29 = vpop.permute.xlu1 %171 }
 0x1fa   :  { %v207_v30 = vpop.permute.xlu1 %206 }
 0x1fb   :  { %v209_v31 = vsel %vm177_vm3, %v207_v30, %v172_v29 }
 0x1fe   :  { %v2286_v32 = vpop.permute.xlu1 %210 }
 0x1ff   :  { %v213_v33 = vmul.f32 %v2286_v32, %v209_v31 }
 0x201   :  { %215 = vrot.lane.b32.xlu0 %v213_v33, %s2158_s29 }
 0x202   :  { %v2292_v34 = vpop.permute.xlu1 %185 }
 0x203   :  { %v188_v39 = vmul.f32 %v2292_v34, %v2255_v21 }
 0x205   :  { %179 = vrot.lane.b32.xlu0 %v2272_v23, %s2150_s22 }
 0x206   :  { %v2294_v35 = vpop.permute.xlu1 %166 }
 0x20a   :  { %v158_v37 = vpop.permute.xlu1 %157 }
 0x20b   :  { %v164_v40 = vsel %vm163_vm4, %v158_v37, %v161_v36 }
 0x20c   :  { %v169_v43 = vmul.f32 %v2294_v35, %v164_v40 }
 0x20e   :  { %v175_v44 = vpop.permute.xlu1 %174  ;;  %v170_v49 = vadd.f32 %v169_v43, %v155_v46  ;;  %v46_v43 = vld [vmem:[%s2624_s6] sm:$0xff] }
 0x20f   :  { %v178_v47 = vsel %vm177_vm3, %v172_v29, %v175_v44  ;;  %v47_v44 = vld [vmem:[%s2624_s6 + $0x8] sm:$0xff] }
 0x268   :  { %v203_v38 = vpop.permute.xlu0 %202 }
 0x269   :  { %v205_v41 = vadd.f32 %v203_v38, %v188_v39 }
 0x273   :  { %v216_v42 = vpop.permute.xlu0 %215 }
 0x274   :  { %v218_v45 = vadd.f32 %v216_v42, %v205_v41 }
 0x276   :  { %227 = vrot.lane.b32.xlu1 %v218_v45, %s2161_s1 }
 0x277   :  { %v2304_v48 = vpop.permute.xlu0 %179 }
 0x278   :  { %v182_v50 = vmul.f32 %v2304_v48, %v178_v47  ;;  %v48_v47 = vld [vmem:[%s2624_s6 + $0x10] sm:$0xff] }
 0x27a   :  { %v183_v51 = vadd.f32 %v182_v50, %v170_v49  ;;  %231 = vrot.lane.b32.xlu1 %v218_v45, %s2157_s28  ;;  %v2000_v45 = vpack.c.bf16 %v47_v44, %v46_v43  ;;  %v49_v49 = vld [vmem:[%s2624_s6 + $0x18] sm:$0xff] }
 0x27b   :  { %v61_v43 = vld [vmem:[%s2626_s8 + $0x38] sm:$0xff] }
 0x27c   :  { %220 = vrot.lane.b32.xlu0 %v183_v51, %s2161_s1  ;;  %1862 = vmatprep.mubr.msk.f32.mxu1 %vm233_vm5, %v183_v51 }
 0x27e   :  { %222 = vrot.lane.b32.xlu1 %v183_v51, %s2151_s23  ;;  %v2003_v51 = vpack.c.bf16 %v49_v49, %v48_v47 }
 0x282   :  { %229 = vrot.lane.b32.xlu1 %v2255_v21, %s2161_s1 }
 0x2e8   :  { %v228_v52 = vpop.permute.xlu1 %227 }
 0x2e9   :  { %315 = vrot.lane.b32.xlu0 %v228_v52, %s2157_s28 }
 0x2ec   :  { %v232_v53 = vpop.permute.xlu1 %231 }
 0x2ed   :  { %1860 = vmatprep.subr.msk.mxu1 %vm233_vm5, %v232_v53 }
 0x2ee   :  { %1861 = vmatpush3.xpose.msk.msra.mxu1 %vm233_vm5, %v232_v53  ;;  %v221_v54 = vpop.permute.xlu0 %220 }
 0x2ef   :  { %224 = vrot.lane.b32.xlu0 %v221_v54, %s2151_s23 }
 0x2f0   :  { %v223_v55 = vpop.permute.xlu1 %222 }
 0x2f1   :  { %1863 = vmatmul.mubr.msk.f32.vlgmr.msra.gmra.mrb[2].mxu1 %vm233_vm5, %v221_v54 }
 0x2f2   :  { %1867 = vmatprep.mubr.msk.f32.mxu1 %vm233_vm5, %v223_v55 }
 0x2f4   :  { %v230_v14 = vpop.permute.xlu1 %229 }
 0x35b   :  { %v316_v56 = vpop.permute.xlu0 %315 }
 0x35c   :  { %1865 = vmatprep.subr.msk.mxu1 %vm233_vm5, %v316_v56 }
 0x35d   :  { %1866 = vmatpush3.xpose.msk.msra.mxu1 %vm233_vm5, %v316_v56 }
 0x361   :  { %v225_v57 = vpop.permute.xlu0 %224 }
 0x362   :  { %1868 = vmatmul.mubr.msk.f32.vlgmr.msra.gmra.mrb[4].mxu1 %vm233_vm5, %v225_v57 }
 0x3c4   :  { %v1864_v62 = vpop.f32.mrb[2].mxu1 }
 0x3c5   :  { %v401_v63 = vsel %vm2322_vm6, %v1864_v62, -1e+30  ;;  %v306_v1 = vpop.f32.mrb[3].mxu1 }
 0x3c6   :  { %v407_v2 = vsel %vm233_vm5, %v401_v63, -inf  ;;  %v400_v3 = vsel %vm2322_vm6, %v306_v1, -1e+30 }
 0x3c7   :  { %408 = vmax.xlane.f32.xlu0 %v407_v2  ;;  %v404_v4 = vsel %vm233_vm5, %v400_v3, -inf }
 0x3cb   :  { %405 = vmax.xlane.f32.xlu0 %v404_v4 }
 0x435   :  { %v1869_v5 = vpop.f32.mrb[4].mxu1 }
 0x436   :  { %v403_v7 = vsel %vm2322_vm6, %v1869_v5, -1e+30  ;;  %v389_v8 = vpop.f32.mrb[5].mxu1 }
 0x437   :  { %v402_v10 = vsel %vm2322_vm6, %v389_v8, -1e+30  ;;  %v413_v12 = vsel %vm233_vm5, %v403_v7, -inf }
 0x438   :  { %414 = vmax.xlane.f32.xlu0 %v413_v12  ;;  %v410_v13 = vsel %vm233_vm5, %v402_v10, -inf }
 0x439   :  { %411 = vmax.xlane.f32.xlu1 %v410_v13 }
 0x44a   :  { %440 = vrot.lane.b32.xlu1 %v2255_v21, %s2162_s13 }
 0x44e   :  { %524 = vrot.lane.b32.xlu0 %v230_v14, %s2162_s13 }
 0x454   :  { %v409_v15 = vpop.xlane.xlu0 %408 }
 0x455   :  { %v417_v16 = vsub.f32 %v401_v63, %v409_v15 }
 0x457   :  { %v422_v20 = vmul.f32 1.442695, %v417_v16  ;;  %v50_v16 = vld [vmem:[%s2625_s7] sm:$0xff] }
 0x458   :  { %v406_v17 = vpop.xlane.xlu0 %405 }
 0x459   :  { %v416_v18 = vsub.f32 %v400_v3, %v406_v17  ;;  %v51_v17 = vld [vmem:[%s2625_s7 + $0x8] sm:$0xff] }
 0x45b   :  { %v420_v19 = vmul.f32 1.442695, %v416_v18  ;;  %v52_v18 = vld [vmem:[%s2625_s7 + $0x10] sm:$0xff] }
 0x45d   :  { %2075 = vpow2.f32 %v420_v19  ;;  %v2006_v19 = vpack.c.bf16 %v51_v17, %v50_v16 }
 0x45e   :  { %2077 = vpow2.f32 %v422_v20 }
 0x467   :  { %v2076_v22 = vpop.eup %2075 }
 0x468   :  { %1872 = vmatprep.mubr.msk.f32.mxu0 %vm233_vm5, %v2076_v22  ;;  %v2078_v25 = vpop.eup %2077  ;;  %v428_v41 = vsel %vm233_vm5, %v2076_v22, 0.0 }
 0x469   :  { %v431_v26 = vsel %vm233_vm5, %v2078_v25, 0.0 }
 0x46e   :  { %432 = vadd.xlane.f32.xlu1 %v431_v26 }
 0x4c5   :  { %v415_v27 = vpop.xlane.xlu0 %414 }
 0x4c6   :  { %v419_v21 = vsub.f32 %v403_v7, %v415_v27  ;;  %v412_v28 = vpop.xlane.xlu1 %411 }
 0x4c7   :  { %v418_v29 = vsub.f32 %v402_v10, %v412_v28 }
 0x4c8   :  { %v426_v30 = vmul.f32 1.442695, %v419_v21 }
 0x4c9   :  { %v424_v31 = vmul.f32 1.442695, %v418_v29  ;;  %v525_v33 = vpop.permute.xlu0 %524 }
 0x4ca   :  { %2079 = vpow2.f32 %v426_v30  ;;  %1875 = vmatprep.subr.mxu1 %v525_v33  ;;  %v441_v36 = vpop.permute.xlu1 %440  ;;  %v54_v30 = vld [vmem:[%s2626_s8] sm:$0xff] }
 0x4cb   :  { %2081 = vpow2.f32 %v424_v31  ;;  %1870 = vmatprep.subr.mxu0 %v441_v36  ;;  %1876 = vmatpush3.msra.mxu1 %v525_v33  ;;  %v55_v31 = vld [vmem:[%s2626_s8 + $0x8] sm:$0xff]  ;;  %v56_v33 = vld [vmem:[%s2626_s8 + $0x10] sm:$0xff] }
 0x4cc   :  { %1871 = vmatpush3.msra.mxu0 %v441_v36  ;;  %2005 = vmatprep.subr.bf16.mxu1 %v2147_v6  ;;  %v2012_v36 = vpack.c.bf16 %v55_v31, %v54_v30 }
 0x4cd   :  { %1873 = vmatmul.mubr.msk.f32.vlgmr.msra.gmra.mrb[0].mxu0 %vm233_vm5, %v2078_v25  ;;  %1999 = vmatprep.subr.bf16.mxu0 %v2147_v6 }
 0x4ce   :  { %1888 = vmatprep.mubr.msk.f32.mxu0 %vm2148_vm1, %v2149_v9  ;;  %2001 = vmatpush3.bf16.msra.mxu0 %v2000_v45 }
 0x4cf   :  { %2002 = vmatprep.subr.bf16.mxu0 %v2147_v6 }
 0x4d2   :  { %2004 = vmatpush3.bf16.msra.mxu0 %v2003_v51 }
 0x4d3   :  { %2011 = vmatprep.subr.bf16.mxu0 %v2147_v6 }
 0x4d4   :  { %v2080_v37 = vpop.eup %2079 }
 0x4d5   :  { %v2082_v38 = vpop.eup %2081  ;;  %v437_v39 = vsel %vm233_vm5, %v2080_v37, 0.0 }
 0x4d6   :  { %438 = vadd.xlane.f32.xlu1 %v437_v39  ;;  %1877 = vmatprep.mubr.msk.f32.mxu1 %vm233_vm5, %v2082_v38  ;;  %v434_v40 = vsel %vm233_vm5, %v2082_v38, 0.0  ;;  %v58_v39 = vld [vmem:[%s2626_s8 + $0x20] sm:$0xff] }
 0x4d7   :  { %1878 = vmatmul.mubr.msk.f32.vlgmr.msra.gmra.mrb[6].mxu1 %vm233_vm5, %v2080_v37  ;;  %435 = vadd.xlane.f32.xlu0 %v434_v40  ;;  %v57_v37 = vld [vmem:[%s2626_s8 + $0x18] sm:$0xff]  ;;  %v59_v40 = vld [vmem:[%s2626_s8 + $0x28] sm:$0xff] }
 0x4d8   :  { %1899 = vmatprep.mubr.msk.f32.mxu1 %vm2148_vm1, %v2149_v9  ;;  %2007 = vmatpush3.bf16.msra.mxu1 %v2006_v19  ;;  %v2015_v38 = vpack.c.bf16 %v57_v37, %v56_v33 }
 0x4d9   :  { %2008 = vmatprep.subr.bf16.mxu1 %v2147_v6 }
 0x4db   :  { %429 = vadd.xlane.f32.xlu0 %v428_v41  ;;  %v2018_v41 = vpack.c.bf16 %v59_v40, %v58_v39 }
 0x4fb   :  { %v433_v42 = vpop.xlane.xlu1 %432 }
 0x4fc   :  { %2083 = vrcp.f32 %v433_v42  ;;  %v60_v42 = vld [vmem:[%s2626_s8 + $0x30] sm:$0xff] }
 0x4fd   :  { %v2021_v44 = vpack.c.bf16 %v61_v43, %v60_v42 }
 0x506   :  { %v2084_v52 = vpop.eup %2083 }
 0x563   :  { %v439_v46 = vpop.xlane.xlu1 %438 }
 0x564   :  { %v436_v50 = vpop.xlane.xlu0 %435  ;;  %2085 = vrcp.f32 %v439_v46 }
 0x565   :  { %2087 = vrcp.f32 %v436_v50 }
 0x568   :  { %v430_v63 = vpop.xlane.xlu0 %429 }
 0x569   :  { %2089 = vrcp.f32 %v430_v63 }
 0x56e   :  { %v2086_v56 = vpop.eup %2085 }
 0x56f   :  { %v2088_v58 = vpop.eup %2087 }
 0x573   :  { %v2090_v1 = vpop.eup %2089 }
 0x5a0   :  { %v1874_v53 = vpop.f32.mrb[0].mxu0 }
 0x5a1   :  { %v613_v54 = vmul.f32 %v2084_v52, %v1874_v53  ;;  %v515_v55 = vpop.f32.mrb[1].mxu0 }
 0x5a2   :  { %v612_v3 = vmul.f32 %v2090_v1, %v515_v55  ;;  %v1742_v1 = vld [vmem:[%s2623_s5 + $0x30] sm:$0xff] }
 0x5a3   :  { %617 = vrot.lane.b32.xlu1 %v613_v54, %s2163_s21 }
 0x5aa   :  { %v1879_v57 = vpop.f32.mrb[6].mxu1 }
 0x5ab   :  { %v615_v59 = vmul.f32 %v2086_v56, %v1879_v57  ;;  %v599_v60 = vpop.f32.mrb[7].mxu1 }
 0x5ac   :  { %v614_v62 = vmul.f32 %v2088_v58, %v599_v60  ;;  %v1740_v60 = vld [vmem:[%s2623_s5 + $0x20] sm:$0xff] }
 0x5ad   :  { %625 = vrot.lane.b32.xlu1 %v615_v59, %s2164_s30 }
 0x5ae   :  { %621 = vrot.lane.b32.xlu0 %v614_v62, %s2628_s10  ;;  %v1741_v62 = vld [vmem:[%s2623_s5 + $0x28] sm:$0xff] }
 0x5af   :  { %v2024_v63 = vpack.c.bf16 %v1741_v62, %v1740_v60 }
 0x5b2   :  { %715 = vrot.lane.b32.xlu0 %v2244_v11, %s2157_s28 }
 0x615   :  { %v618_v2 = vpop.permute.xlu1 %617 }
 0x616   :  { %v628_v4 = vsel %vm233_vm5, %v612_v3, %v618_v2  ;;  %v1743_v2 = vld [vmem:[%s2623_s5 + $0x38] sm:$0xff] }
 0x617   :  { %v2027_v3 = vpack.c.bf16 %v1743_v2, %v1742_v1 }
 0x61f   :  { %v626_v7 = vpop.permute.xlu1 %625 }
 0x620   :  { %v622_v5 = vpop.permute.xlu0 %621 }
 0x621   :  { %v630_v8 = vsel %vm629_vm7, %v628_v4, %v622_v5  ;;  %v2449_v4 = vld [vmem:[%s2622_s4 + $0x1] ss:$0 sm:$0xff] }
 0x622   :  { %v632_v10 = vsel %vm631_vm8, %v630_v8, %v626_v7 }
 0x623   :  { %1889 = vmatmul.mubr.msk.f32.vlgmr.msra.gmra.mrb[2].mxu0 %vm63_vm0, %v632_v10 }
 0x624   :  { %1918 = vmatprep.mubr.msk.f32.mxu0 %vm2148_vm1, %v2149_v9  ;;  %v716_v21 = vpop.permute.xlu0 %715  ;;  %2013 = vmatpush3.bf16.msra.mxu0 %v2012_v36 }
 0x625   :  { %2014 = vmatprep.subr.bf16.mxu0 %v2147_v6 }
 0x628   :  { %2016 = vmatpush3.bf16.msra.mxu0 %v2015_v38 }
 0x629   :  { %2017 = vmatprep.subr.bf16.mxu0 %v2147_v6 }
 0x62c   :  { %2019 = vmatpush3.bf16.msra.mxu0 %v2018_v41 }
 0x62d   :  { %2020 = vmatprep.subr.bf16.mxu0 %v2147_v6 }
 0x630   :  { %2022 = vmatpush3.bf16.msra.mxu0 %v2021_v44 }
 0x6f6   :  { %v702_v11 = vpop.f32.mrb[2].mxu0 }
 0x6f7   :  { %v706_v12 = vadd.f32 %v702_v11, %v2220_v0  ;;  %v1890_v13 = vpop.f32.mrb[3].mxu0  ;;  %v53_v0 = vld [vmem:[%s2625_s7 + $0x18] sm:$0xff] }
 0x6f8   :  { %v2009_v20 = vpack.c.bf16 %v53_v0, %v52_v18 }
 0x6f9   :  { %v707_v14 = vmul.f32 %v706_v12, %v706_v12 }
 0x6fa   :  { %2010 = vmatpush3.bf16.msra.mxu1 %v2009_v20 }
 0x6fb   :  { %v708_v15 = vsel %vm63_vm0, %v707_v14, 0.0  ;;  %2023 = vmatprep.subr.bf16.mxu1 %v2147_v6 }
 0x6fc   :  { %709 = vadd.xlane.f32.xlu1 %v708_v15 }
 0x70d   :  { %919 = vrot.lane.b32.xlu1 %v2449_v4, %s2150_s22 }
 0x789   :  { %v710_v22 = vpop.xlane.xlu1 %709 }
 0x78a   :  { %v711_v25 = vmul.f32 0.03125, %v710_v22 }
 0x78c   :  { %v712_v26 = vadd.f32 1e-05, %v711_v25 }
 0x78d   :  { %v920_v13 = vpop.permute.xlu1 %919 }
 0x78e   :  { %2091 = vrsqrt.f32 %v712_v26 }
 0x798   :  { %v2092_v27 = vpop.eup %2091 }
 0x799   :  { %v714_v28 = vmul.f32 %v2092_v27, %v706_v12 }
 0x79b   :  { %v718_v29 = vmul.f32 %v716_v21, %v714_v28 }
 0x79d   :  { %1900 = vmatmul.mubr.msk.f32.vlgmr.msra.gmra.mrb[8].mxu1 %vm63_vm0, %v718_v29 }
 0x79e   :  { %1929 = vmatprep.mubr.msk.f32.mxu1 %vm2148_vm1, %v2149_v9  ;;  %2025 = vmatpush3.bf16.msra.mxu1 %v2024_v63 }
 0x79f   :  { %2026 = vmatprep.subr.bf16.mxu1 %v2147_v6 }
 0x7a2   :  { %2028 = vmatpush3.bf16.msra.mxu1 %v2027_v3 }
 0x870   :  { %v788_v45 = vpop.f32.mrb[8].mxu1 }
 0x871   :  { %800 = vrot.lane.b32.xlu0 %v788_v45, %s2150_s22  ;;  %v1901_v46 = vpop.f32.mrb[9].mxu1  ;;  %v1737_v47 = vmul.f32 -1.442695, %v788_v45 }
 0x873   :  { %2093 = vpow2.f32 %v1737_v47 }
 0x87d   :  { %v2094_v49 = vpop.eup %2093 }
 0x87e   :  { %v795_v50 = vadd.f32 1.0, %v2094_v49 }
 0x880   :  { %2095 = vrcp.f32 %v795_v50 }
 0x88a   :  { %v2096_v51 = vpop.eup %2095 }
 0x88b   :  { %v798_v52 = vmul.f32 %v2096_v51, %v788_v45 }
 0x8e3   :  { %v801_v53 = vpop.permute.xlu0 %800 }
 0x8e4   :  { %v803_v54 = vmul.f32 %v801_v53, %v798_v52 }
 0x8e6   :  { %1919 = vmatmul.mubr.msk.f32.vlgmr.msra.gmra.mrb[4].mxu0 %vm804_vm9, %v803_v54 }
 0x9b9   :  { %v874_v55 = vpop.f32.mrb[4].mxu0 }
 0x9ba   :  { %v2428_v56 = vadd.f32 %v874_v55, %v706_v12  ;;  %v1920_v57 = vpop.f32.mrb[5].mxu0 }
 0x9bc   :  { %v904_v58 = vmul.f32 %v2428_v56, %v2428_v56 }
 0x9be   :  { %v905_v59 = vsel %vm63_vm0, %v904_v58, 0.0 }
 0x9bf   :  { %906 = vadd.xlane.f32.xlu0 %v905_v59 }
 0xa4c   :  { %v907_v5 = vpop.xlane.xlu0 %906 }
 0xa4d   :  { %v908_v7 = vmul.f32 0.03125, %v907_v5 }
 0xa4f   :  { %v909_v8 = vadd.f32 1e-05, %v908_v7 }
 0xa51   :  { %2097 = vrsqrt.f32 %v909_v8 }
 0xa5b   :  { %v2098_v10 = vpop.eup %2097 }
 0xa5c   :  { %v911_v11 = vmul.f32 %v2098_v10, %v2428_v56 }
 0xa5e   :  { %v918_v12 = vmul.f32 %v2449_v4, %v911_v11 }
 0xa60   :  { %1930 = vmatmul.mubr.msk.f32.vlgmr.msra.gmra.mrb[10].mxu1 %vm63_vm0, %v918_v12 }
 0xb33   :  { %v991_v14 = vpop.f32.mrb[10].mxu1 }
 0xb34   :  { %v2456_v15 = vadd.f32 %v991_v14, %v920_v13  ;;  %v1931_v16 = vpop.f32.mrb[11].mxu1 }
 0xb36   :  { %1019 = vrot.lane.b32.xlu1 %v2456_v15, %s2154_s25  ;;  %1016 = vrot.lane.b32.xlu0 %v2456_v15, %s2153_s24  ;;  %v995_v30 = vmul.f32 %v2456_v15, %v2272_v23  ;;  %v1015_v33 = vmul.f32 %v2456_v15, %v2292_v34 }
 0xb3a   :  { %1006 = vrot.lane.b32.xlu1 %v2456_v15, %s2155_s26  ;;  %1000 = vrot.lane.b32.xlu0 %v2456_v15, %s2152_s2  ;;  %s2166_s26 = smov [#allocation2]  }
 0xb3e   :  { %1029 = vrot.lane.b32.xlu1 %v2456_v15, %s2156_s27  ;;  %s1715_s27 = sshll.u32 %s2166_s26, 4  ;;  %s1716_s27 = int_to_ptr.vmem [resolvable:$true] %s1715_s27 }
 0xb3f   :  { %p2128_p1 = scmp.lt.s32.totalorder %s1716_s27, %s1716_s27 }
 0xb42   :  { %997 = vrot.lane.b32.xlu1 %v2456_v15, %s2159_s11 }
 0xba8   :  { %v1020_v17 = vpop.permute.xlu1 %1019  ;;  %v1017_v18 = vpop.permute.xlu0 %1016 }
 0xba9   :  { %v1022_v19 = vsel %vm195_vm2, %v1017_v18, %v1020_v17 }
 0xbaa   :  { %v1023_v0 = vmul.f32 %v1022_v19, %v2280_v24 }
 0xbac   :  { %v1007_v20 = vpop.permute.xlu1 %1006  ;;  %1025 = vrot.lane.b32.xlu0 %v1023_v0, %s2158_s29  ;;  %v1001_v27 = vpop.permute.xlu0 %1000 }
 0xbb0   :  { %v1030_v22 = vpop.permute.xlu1 %1029  ;;  %1009 = vrot.lane.b32.xlu0 %v2456_v15, %s2160_s12 }
 0xbb1   :  { %v1032_v25 = vsel %vm177_vm3, %v1030_v22, %v1007_v20  ;;  %v1744_v22 = vld [vmem:[%s2624_s6 + $0x20] sm:$0xff] }
 0xbb2   :  { %v1033_v26 = vmul.f32 %v1032_v25, %v2286_v32  ;;  %v1745_v25 = vld [vmem:[%s2624_s6 + $0x28] sm:$0xff] }
 0xbb4   :  { %1035 = vrot.lane.b32.xlu1 %v1033_v26, %s2158_s29  ;;  %v998_v21 = vpop.permute.xlu1 %997  ;;  %v2030_v26 = vpack.c.bf16 %v1745_v25, %v1744_v22 }
 0xbb5   :  { %v1003_v28 = vsel %vm163_vm4, %v998_v21, %v1001_v27  ;;  %v1746_v21 = vld [vmem:[%s2624_s6 + $0x30] sm:$0xff] }
 0xbb6   :  { %v1004_v24 = vmul.f32 %v1003_v28, %v2294_v35  ;;  %v1747_v28 = vld [vmem:[%s2624_s6 + $0x38] sm:$0xff]  ;;  %s2631_s6 = smov 16  }
 0xbb8   :  { %v1005_v37 = vadd.f32 %v1004_v24, %v995_v30  ;;  %v2033_v24 = vpack.c.bf16 %v1747_v28, %v1746_v21 }
 0xc1e   :  { %v1026_v29 = vpop.permute.xlu0 %1025 }
 0xc1f   :  { %v1028_v38 = vadd.f32 %v1026_v29, %v1015_v33 }
 0xc22   :  { %v1010_v31 = vpop.permute.xlu0 %1009 }
 0xc23   :  { %v1012_v36 = vsel %vm177_vm3, %v1007_v20, %v1010_v31 }
 0xc24   :  { %v1013_v32 = vmul.f32 %v1012_v36, %v2304_v48 }
 0xc26   :  { %v1036_v39 = vpop.permute.xlu1 %1035  ;;  %v1014_v40 = vadd.f32 %v1013_v32, %v1005_v37 }
 0xc27   :  { %v1038_v41 = vadd.f32 %v1036_v39, %v1028_v38 }
 0xc28   :  { %1040 = vrot.lane.b32.xlu0 %v1014_v40, %s2161_s1  ;;  %1934 = vmatprep.mubr.msk.f32.mxu1 %vm233_vm5, %v1014_v40 }
 0xc29   :  { %1047 = vrot.lane.b32.xlu1 %v1038_v41, %s2161_s1 }
 0xc2d   :  { %1051 = vrot.lane.b32.xlu1 %v1038_v41, %s2157_s28 }
 0xc31   :  { %1042 = vrot.lane.b32.xlu1 %v1014_v40, %s2151_s23 }
 0xc35   :  { %1049 = vrot.lane.b32.xlu1 %v2456_v15, %s2161_s1 }
 0xc9a   :  { %v1041_v34 = vpop.permute.xlu0 %1040 }
 0xc9b   :  { %v1048_v23 = vpop.permute.xlu1 %1047 }
 0xc9c   :  { %1134 = vrot.lane.b32.xlu0 %v1048_v23, %s2157_s28 }
 0xc9f   :  { %v1052_v35 = vpop.permute.xlu1 %1051 }
 0xca0   :  { %1932 = vmatprep.subr.msk.mxu1 %vm233_vm5, %v1052_v35  ;;  %1044 = vrot.lane.b32.xlu0 %v1041_v34, %s2151_s23 }
 0xca1   :  { %1933 = vmatpush3.xpose.msk.msra.mxu1 %vm233_vm5, %v1052_v35 }
 0xca3   :  { %v1043_v48 = vpop.permute.xlu1 %1042 }
 0xca4   :  { %1935 = vmatmul.mubr.msk.f32.vlgmr.msra.gmra.mrb[12].mxu1 %vm233_vm5, %v1041_v34 }
 0xca5   :  { %1939 = vmatprep.mubr.msk.f32.mxu1 %vm233_vm5, %v1043_v48 }
 0xca7   :  { %v1050_v58 = vpop.permute.xlu1 %1049 }
 0xd0e   :  { %v1135_v42 = vpop.permute.xlu0 %1134 }
 0xd0f   :  { %1937 = vmatprep.subr.msk.mxu1 %vm233_vm5, %v1135_v42 }
 0xd10   :  { %1938 = vmatpush3.xpose.msk.msra.mxu1 %vm233_vm5, %v1135_v42 }
 0xd12   :  { %v1045_v43 = vpop.permute.xlu0 %1044 }
 0xd13   :  { %1940 = vmatmul.mubr.msk.f32.vlgmr.msra.gmra.mrb[14].mxu1 %vm233_vm5, %v1045_v43 }
 0xd77   :  { %v1936_v44 = vpop.f32.mrb[12].mxu1 }
 0xd78   :  { %v1218_v45 = vsel %vm2322_vm6, %v1936_v44, -1e+30  ;;  %v1125_v46 = vpop.f32.mrb[13].mxu1 }
 0xd79   :  { %v1224_v47 = vsel %vm233_vm5, %v1218_v45, -inf  ;;  %v1217_v49 = vsel %vm2322_vm6, %v1125_v46, -1e+30 }
 0xd7a   :  { %1225 = vmax.xlane.f32.xlu0 %v1224_v47  ;;  %v1221_v50 = vsel %vm233_vm5, %v1217_v49, -inf }
 0xd7e   :  { %1222 = vmax.xlane.f32.xlu0 %v1221_v50 }
 0xde6   :  { %v1941_v51 = vpop.f32.mrb[14].mxu1 }
 0xde7   :  { %v1220_v52 = vsel %vm2322_vm6, %v1941_v51, -1e+30  ;;  %v1208_v53 = vpop.f32.mrb[15].mxu1 }
 0xde8   :  { %v1219_v54 = vsel %vm2322_vm6, %v1208_v53, -1e+30  ;;  %v1230_v55 = vsel %vm233_vm5, %v1220_v52, -inf  ;;  %v1749_v53 = vld [vmem:[%s2625_s7 + $0x28] sm:$0xff] }
 0xde9   :  { %1231 = vmax.xlane.f32.xlu0 %v1230_v55  ;;  %v1227_v57 = vsel %vm233_vm5, %v1219_v54, -inf }
 0xdea   :  { %1228 = vmax.xlane.f32.xlu1 %v1227_v57 }
 0xdfb   :  { %1257 = vrot.lane.b32.xlu1 %v2456_v15, %s2162_s13 }
 0xdff   :  { %1341 = vrot.lane.b32.xlu0 %v1050_v58, %s2162_s13 }
 0xe07   :  { %v1226_v59 = vpop.xlane.xlu0 %1225 }
 0xe08   :  { %v1234_v60 = vsub.f32 %v1218_v45, %v1226_v59 }
 0xe0a   :  { %v1239_v1 = vmul.f32 1.442695, %v1234_v60 }
 0xe0b   :  { %v1223_v62 = vpop.xlane.xlu0 %1222 }
 0xe0c   :  { %v1233_v63 = vsub.f32 %v1217_v49, %v1223_v62 }
 0xe0e   :  { %v1237_v2 = vmul.f32 1.442695, %v1233_v63 }
 0xe10   :  { %2099 = vpow2.f32 %v1237_v2  ;;  %v1752_v2 = vld [vmem:[%s2626_s8 + $0x40] sm:$0xff] }
 0xe11   :  { %2101 = vpow2.f32 %v1239_v1 }
 0xe1a   :  { %v2100_v61 = vpop.eup %2099 }
 0xe1b   :  { %v2102_v3 = vpop.eup %2101  ;;  %1944 = vmatprep.mubr.msk.f32.mxu0 %vm233_vm5, %v2100_v61  ;;  %v1245_v0 = vsel %vm233_vm5, %v2100_v61, 0.0  ;;  %v1753_v61 = vld [vmem:[%s2626_s8 + $0x48] sm:$0xff] }
 0xe1c   :  { %v1248_v5 = vsel %vm233_vm5, %v2102_v3, 0.0 }
 0xe1f   :  { %1249 = vadd.xlane.f32.xlu1 %v1248_v5  ;;  %v2042_v5 = vpack.c.bf16 %v1753_v61, %v1752_v2 }
 0xe76   :  { %v1232_v7 = vpop.xlane.xlu0 %1231 }
 0xe77   :  { %v1236_v8 = vsub.f32 %v1220_v52, %v1232_v7  ;;  %v1229_v10 = vpop.xlane.xlu1 %1228  ;;  %v1748_v52 = vld [vmem:[%s2625_s7 + $0x20] sm:$0xff]  ;;  %v1755_v7 = vld [vmem:[%s2626_s8 + $0x58] sm:$0xff] }
 0xe78   :  { %v1235_v11 = vsub.f32 %v1219_v54, %v1229_v10  ;;  %v2036_v54 = vpack.c.bf16 %v1749_v53, %v1748_v52  ;;  %v1756_v10 = vld [vmem:[%s2626_s8 + $0x60] sm:$0xff] }
 0xe79   :  { %v1243_v12 = vmul.f32 1.442695, %v1236_v8 }
 0xe7a   :  { %v1241_v13 = vmul.f32 1.442695, %v1235_v11  ;;  %v1342_v14 = vpop.permute.xlu0 %1341  ;;  %v1757_v11 = vld [vmem:[%s2626_s8 + $0x68] sm:$0xff] }
 0xe7b   :  { %2103 = vpow2.f32 %v1243_v12  ;;  %1947 = vmatprep.subr.mxu1 %v1342_v14  ;;  %v1258_v15 = vpop.permute.xlu1 %1257  ;;  %v2048_v12 = vpack.c.bf16 %v1757_v11, %v1756_v10 }
 0xe7c   :  { %2105 = vpow2.f32 %v1241_v13  ;;  %1942 = vmatprep.subr.mxu0 %v1258_v15  ;;  %1948 = vmatpush3.msra.mxu1 %v1342_v14  ;;  %v1758_v13 = vld [vmem:[%s2626_s8 + $0x70] sm:$0xff]  ;;  %v1759_v14 = vld [vmem:[%s2626_s8 + $0x78] sm:$0xff] }
 0xe7d   :  { %1943 = vmatpush3.msra.mxu0 %v1258_v15  ;;  %2035 = vmatprep.subr.bf16.mxu1 %v2147_v6  ;;  %v2051_v15 = vpack.c.bf16 %v1759_v14, %v1758_v13 }
 0xe7e   :  { %1945 = vmatmul.mubr.msk.f32.vlgmr.msra.gmra.mrb[6].mxu0 %vm233_vm5, %v2102_v3  ;;  %2029 = vmatprep.subr.bf16.mxu0 %v2147_v6  ;;  %v1754_v3 = vld [vmem:[%s2626_s8 + $0x50] sm:$0xff] }
 0xe7f   :  { %1960 = vmatprep.mubr.msk.f32.mxu0 %vm2148_vm1, %v2149_v9  ;;  %2031 = vmatpush3.bf16.msra.mxu0 %v2030_v26  ;;  %v2045_v8 = vpack.c.bf16 %v1755_v7, %v1754_v3 }
 0xe80   :  { %2032 = vmatprep.subr.bf16.mxu0 %v2147_v6 }
 0xe83   :  { %2034 = vmatpush3.bf16.msra.mxu0 %v2033_v24 }
 0xe84   :  { %2041 = vmatprep.subr.bf16.mxu0 %v2147_v6 }
 0xe85   :  { %v2104_v16 = vpop.eup %2103 }
 0xe86   :  { %v2106_v17 = vpop.eup %2105  ;;  %v1254_v18 = vsel %vm233_vm5, %v2104_v16, 0.0 }
 0xe87   :  { %1255 = vadd.xlane.f32.xlu1 %v1254_v18  ;;  %1949 = vmatprep.mubr.msk.f32.mxu1 %vm233_vm5, %v2106_v17  ;;  %v1251_v19 = vsel %vm233_vm5, %v2106_v17, 0.0 }
 0xe88   :  { %1950 = vmatmul.mubr.msk.f32.vlgmr.msra.gmra.mrb[16].mxu1 %vm233_vm5, %v2104_v16  ;;  %1252 = vadd.xlane.f32.xlu0 %v1251_v19 }
 0xe89   :  { %1971 = vmatprep.mubr.msk.f32.mxu1 %vm2148_vm1, %v2149_v9  ;;  %2037 = vmatpush3.bf16.msra.mxu1 %v2036_v54 }
 0xe8a   :  { %2038 = vmatprep.subr.bf16.mxu1 %v2147_v6 }
 0xe8c   :  { %1246 = vadd.xlane.f32.xlu0 %v1245_v0 }
 0xeac   :  { %v1250_v20 = vpop.xlane.xlu1 %1249 }
 0xead   :  { %2107 = vrcp.f32 %v1250_v20 }
 0xeb7   :  { %v2108_v30 = vpop.eup %2107 }
 0xf14   :  { %v1256_v27 = vpop.xlane.xlu1 %1255 }
 0xf15   :  { %v1253_v29 = vpop.xlane.xlu0 %1252  ;;  %2109 = vrcp.f32 %v1256_v27 }
 0xf16   :  { %2111 = vrcp.f32 %v1253_v29 }
 0xf19   :  { %v1247_v23 = vpop.xlane.xlu0 %1246 }
 0xf1a   :  { %2113 = vrcp.f32 %v1247_v23 }
 0xf1f   :  { %v2110_v37 = vpop.eup %2109 }
 0xf20   :  { %v2112_v38 = vpop.eup %2111 }
 0xf24   :  { %v2114_v34 = vpop.eup %2113 }
 0xf51   :  { %v1946_v31 = vpop.f32.mrb[6].mxu0 }
 0xf52   :  { %v1430_v33 = vmul.f32 %v2108_v30, %v1946_v31  ;;  %v1332_v36 = vpop.f32.mrb[7].mxu0 }
 0xf53   :  { %v1429_v48 = vmul.f32 %v2114_v34, %v1332_v36  ;;  %v1776_v36 = vld [vmem:[%s2621_s3] ss:$0 sm:$0xff] }
 0xf54   :  { %1434 = vrot.lane.b32.xlu1 %v1430_v33, %s2163_s21 }
 0xf5b   :  { %v1951_v32 = vpop.f32.mrb[16].mxu1 }
 0xf5c   :  { %v1432_v39 = vmul.f32 %v2110_v37, %v1951_v32  ;;  %v1416_v40 = vpop.f32.mrb[17].mxu1 }
 0xf5d   :  { %v1431_v41 = vmul.f32 %v2112_v38, %v1416_v40 }
 0xf5e   :  { %1442 = vrot.lane.b32.xlu1 %v1432_v39, %s2164_s30 }
 0xf5f   :  { %1438 = vrot.lane.b32.xlu0 %v1431_v41, %s2631_s6  ;;  %s2123_s6 = scalar_lea.vmem %s1716_s27, 128 }
 0xf60   :  { %p2124_p0 = scmp.ne.s32.totalorder %s1716_s27, %s2123_s6  ;;  %p2129_p2 = scmp.lt.s32.totalorder %s2123_s6, %s2123_s6 }
 0xf62   :  { %p2130_p3 = por %p2129_p2, %p2128_p1 }
 0xf63   :  { %1530 = vrot.lane.b32.xlu0 %v2449_v4, %s2157_s28 }
 0xf64   :  { %p2131_p4 = pnand %p2130_p3, %p2124_p0 }
 0xfc6   :  { %v1435_v35 = vpop.permute.xlu1 %1434 }
 0xfc7   :  { %v1445_v42 = vsel %vm233_vm5, %v1429_v48, %v1435_v35 }
 0xfd0   :  { %v1443_v44 = vpop.permute.xlu1 %1442 }
 0xfd1   :  { %v1439_v43 = vpop.permute.xlu0 %1438 }
 0xfd2   :  { %v1446_v45 = vsel %vm629_vm7, %v1445_v42, %v1439_v43 }
 0xfd3   :  { %v1447_v46 = vsel %vm631_vm8, %v1446_v45, %v1443_v44 }
 0xfd4   :  { %1961 = vmatmul.mubr.msk.f32.vlgmr.msra.gmra.mrb[8].mxu0 %vm63_vm0, %v1447_v46 }
 0xfd5   :  { %1990 = vmatprep.mubr.msk.f32.mxu0 %vm2148_vm1, %v2149_v9  ;;  %v1750_v9 = vld [vmem:[%s2625_s7 + $0x30] sm:$0xff]  ;;  %v1531_v62 = vpop.permute.xlu0 %1530  ;;  %2043 = vmatpush3.bf16.msra.mxu0 %v2042_v5 }
 0xfd6   :  { %2044 = vmatprep.subr.bf16.mxu0 %v2147_v6 }
 0xfd9   :  { %2046 = vmatpush3.bf16.msra.mxu0 %v2045_v8 }
 0xfda   :  { %2047 = vmatprep.subr.bf16.mxu0 %v2147_v6 }
 0xfdd   :  { %2049 = vmatpush3.bf16.msra.mxu0 %v2048_v12 }
 0xfde   :  { %2050 = vmatprep.subr.bf16.mxu0 %v2147_v6 }
 0xfe1   :  { %2052 = vmatpush3.bf16.msra.mxu0 %v2051_v15 }
0x10a7   :  { %v1517_v47 = vpop.f32.mrb[8].mxu0 }
0x10a8   :  { %v1521_v4 = vadd.f32 %v1517_v47, %v2428_v56  ;;  %v1962_v49 = vpop.f32.mrb[9].mxu0  ;;  %v1751_v56 = vld [vmem:[%s2625_s7 + $0x38] sm:$0xff] }
0x10a9   :  { %v2039_v55 = vpack.c.bf16 %v1751_v56, %v1750_v9 }
0x10aa   :  { %v1522_v50 = vmul.f32 %v1521_v4, %v1521_v4 }
0x10ab   :  { %2040 = vmatpush3.bf16.msra.mxu1 %v2039_v55 }
0x10ac   :  { %v1523_v51 = vsel %vm63_vm0, %v1522_v50, 0.0 }
0x10ad   :  { %1524 = vadd.xlane.f32.xlu1 %v1523_v51 }
0x113a   :  { %v1525_v57 = vpop.xlane.xlu1 %1524 }
0x113b   :  { %v1526_v58 = vmul.f32 0.03125, %v1525_v57 }
0x113d   :  { %v1527_v59 = vadd.f32 1e-05, %v1526_v58 }
0x113f   :  { %2115 = vrsqrt.f32 %v1527_v59 }
0x1149   :  { %v2116_v60 = vpop.eup %2115 }
0x114a   :  { %v1529_v63 = vmul.f32 %v2116_v60, %v1521_v4 }
0x114c   :  { %v1533_v1 = vmul.f32 %v1531_v62, %v1529_v63 }
0x114e   :  { %1972 = vmatmul.mubr.msk.f32.vlgmr.msra.gmra.mrb[18].mxu1 %vm63_vm0, %v1533_v1 }
0x1221   :  { %v1603_v16 = vpop.f32.mrb[18].mxu1 }
0x1222   :  { %1615 = vrot.lane.b32.xlu0 %v1603_v16, %s2150_s22  ;;  %v1973_v17 = vpop.f32.mrb[19].mxu1  ;;  %v1774_v18 = vmul.f32 -1.442695, %v1603_v16 }
0x1224   :  { %2117 = vpow2.f32 %v1774_v18 }
0x122e   :  { %v2118_v19 = vpop.eup %2117 }
0x122f   :  { %v1610_v0 = vadd.f32 1.0, %v2118_v19 }
0x1231   :  { %2119 = vrcp.f32 %v1610_v0 }
0x123b   :  { %v2120_v20 = vpop.eup %2119 }
0x123c   :  { %v1613_v22 = vmul.f32 %v2120_v20, %v1603_v16 }
0x1294   :  { %v1616_v25 = vpop.permute.xlu0 %1615 }
0x1295   :  { %v1618_v26 = vmul.f32 %v1616_v25, %v1613_v22 }
0x1297   :  { %1991 = vmatmul.mubr.msk.f32.vlgmr.msra.gmra.mrb[10].mxu0 %vm804_vm9, %v1618_v26 }
0x136a   :  { %v1688_v27 = vpop.f32.mrb[10].mxu0 }
0x136b   :  { %v1689_v21 = vadd.f32 %v1688_v27, %v1521_v4  ;;  %v1992_v28 = vpop.f32.mrb[11].mxu0 }
0x136d   :  { %v1693_v6 = vmul.f32 %v1689_v21, %v1689_v21 }
0x136f   :  { %v1694_v29 = vsel %vm63_vm0, %v1693_v6, 0.0 }
0x1370   :  { %1695 = vadd.xlane.f32.xlu0 %v1694_v29 }
0x13fd   :  { %v1696_v24 = vpop.xlane.xlu0 %1695 }
0x13fe   :  { %v1697_v30 = vmul.f32 0.03125, %v1696_v24 }
0x1400   :  { %v1698_v31 = vadd.f32 1e-05, %v1697_v30 }
0x1402   :  { %2121 = vrsqrt.f32 %v1698_v31 }
0x140c   :  { %v2122_v33 = vpop.eup %2121 }
0x140d   :  { %v1700_v37 = vmul.f32 %v2122_v33, %v1689_v21 }
0x140f   :  { %v1707_v32 = vmul.f32 %v1776_v36, %v1700_v37 }
0x1411   :  { %1708 = vst.msk [vmem:[#allocation2] sm:$0xff] %vm63_vm0, %v1707_v32 }
0x1412   :  { %2134 = shalt.err (!%p2131_p4)
}
0x1413   :  { %s2135_s11 = scalar_lea.hbm %s2627_s9, 128 }
0x1414   :  { %p2136_p5 = scmp.ne.s32.totalorder %s2627_s9, %s2135_s11  ;;  %p2139_p6 = scmp.lt.u32.totalorder %s2135_s11, %s2627_s9 }
0x1416   :  { %p2141_p7 = pnand %p2139_p6, %p2136_p5 }
0x1418   :  { %2144 = shalt.err (!%p2141_p7)
}
0x1419   :  { %1718 = dma.vmem_to_hbm [thread:$0]  %s1716_s27, 128, %s2627_s9, [#allocation3]  }
0x141a   :  { %2145 = dma.done.wait [#allocation3], 128  }
0x141b   :  { %2146 = vsyncadd [#allocation3], 4294967168 }
0x141c   :  { %1722 = vsyncpa [#allocation3], 1 }

</bundles_post_ra>
